<compile_context>
chip_gen: v6e
topology: v6e:2x2x1
jax: 0.10.0
libtpu: 0.0.40
codegen_flags: <defaults>
</compile_context>

<pallas_src>
import jax
import jax.numpy as jnp
from jax import lax
from jax.experimental import pallas as pl
from jax.experimental.pallas import tpu as pltpu


def _round_up(x, m):
    return ((x + m - 1) // m) * m


def _lstm_classifier_kernel(
    x_ref,      # (T, BB, D)  bf16 embedded tokens (time-major)
    len_ref,    # (BB, 1)     i32 sequence lengths (clamped to [0, T])
    wx_ref,     # (D, 4H)     bf16 fused input->gate weights   [f | i | o | c]
    wh_ref,     # (H, 4H)     bf16 fused hidden->gate weights  [f | i | o | c]
    b_ref,      # (1, 4H)     f32 fused gate bias
    fcw_ref,    # (1, H)      f32 classifier weight (row vector)
    fcb_ref,    # (1, 1)      f32 classifier bias
    out_ref,    # (1, BB)     f32 sigmoid output (lane-dense row)
    xproj_ref,  # (T, BB, 4H) f32 VMEM scratch: hoisted input projections
):
    T, BB, D = x_ref.shape
    H = wh_ref.shape[0]

    # Weight / metadata loads hoisted out of the recurrence (read once).
    wx = wx_ref[...]
    wh = wh_ref[...]
    bias = b_ref[...]
    lengths = len_ref[...]          # (BB, 1) int32
    fcw = fcw_ref[...]              # (1, H)
    fcb = fcb_ref[...]              # (1, 1)

    unroll = T if T <= 16 else 8    # full unroll only for short fixed T

    # Input projection has no h dependence -> hoisted ahead of the serial chain.
    # Loop over T (instead of reshaping to (T*BB, D)) so no VMEM copy of the
    # largest resident buffer is materialized.
    def proj_step(t, carry):
        xproj_ref[t] = (
            jnp.dot(x_ref[t], wx, preferred_element_type=jnp.float32) + bias)
        return carry

    lax.fori_loop(0, T, proj_step, 0, unroll=unroll)

    def step(t, carry):
        c, h, last = carry
        # Single (BB,H)@(H,4H) bf16 MXU matmul per step on the serial h chain.
        gates = xproj_ref[t] + jnp.dot(
            h.astype(jnp.bfloat16), wh, preferred_element_type=jnp.float32)
        # Gate packing is [f | i | o | c]: one sigmoid over a lane-dense 3H slab
        # + one tanh over the remaining H lanes.
        sig = jax.nn.sigmoid(gates[:, : 3 * H])
        f = sig[:, 0 * H:1 * H]
        i = sig[:, 1 * H:2 * H]
        o = sig[:, 2 * H:3 * H]
        c_hat = jnp.tanh(gates[:, 3 * H:])
        c_next = f * c + i * c_hat
        h_next = o * jnp.tanh(c_next)
        # hidden_outputs[lengths[b]] selection: hidden_outputs[t+1] == h_next;
        # `last` starts at zeros == hidden_outputs[0] (covers lengths == 0).
        last_next = jnp.where(lengths == (t + 1), h_next, last)
        return (c_next, h_next, last_next)

    zeros = jnp.zeros((BB, H), jnp.float32)
    _, _, last = lax.fori_loop(0, T, step, (zeros, zeros, zeros), unroll=unroll)

    # Classifier head: (1,H) x (BB,H)^T contraction -> naturally lane-dense
    # (1, BB) output row (avoids masked (BB,1) partial stores).
    logits = lax.dot_general(
        fcw, last, (((1,), (1,)), ((), ())),
        preferred_element_type=jnp.float32) + fcb
    out_ref[...] = jax.nn.sigmoid(logits)


def lstm_classifier_forward(tokens, lengths, params, *, max_block_b=256):
    """tokens: (B, T) int32, lengths: (B,) int32.  Returns (B, 1) f32."""
    B, T = tokens.shape
    emb = params["embedding"]                       # (vocab, D)
    D = emb.shape[1]
    H = params["whf"].shape[0]

    # Batch tile: as large as the real batch allows (cap 256 for v6e/v7x; pass
    # max_block_b=128 on v5e's 128-wide MXU), 8-sublane padding as the
    # tiny-batch fallback.  Padded rows get length 0 and are sliced off.
    block_b = min(max_block_b, _round_up(B, 8))
    B_pad = _round_up(B, block_b)
    nb = B_pad // block_b

    if B_pad != B:
        tokens = jnp.pad(tokens, ((0, B_pad - B), (0, 0)))
        lengths = jnp.pad(lengths, (0, B_pad - B))

    # Clamp so lengths > T behave like the reference's clamped gather.
    lengths = jnp.clip(lengths.astype(jnp.int32), 0, T)

    # Embedding lookup (gather glue stays in plain JAX) directly into the
    # time-major layout; bf16 operands for the MXU.
    x_emb = jnp.take(emb, tokens.T, axis=0).astype(jnp.bfloat16)   # (T,B_pad,D)
    len2d = lengths.reshape(B_pad, 1)

    # Fuse the four gates along the output axis as [f | i | o | c] lanes.
    wx = jnp.concatenate(
        [params["wxf"], params["wxi"], params["wxo"], params["wxc"]],
        axis=1).astype(jnp.bfloat16)                                 # (D, 4H)
    wh = jnp.concatenate(
        [params["whf"], params["whi"], params["who"], params["whc"]],
        axis=1).astype(jnp.bfloat16)                                 # (H, 4H)
    b = jnp.concatenate(
        [params["bf"], params["bi"], params["bo"], params["bc"]], axis=1)  # (1,4H)
    fcw_row = params["fcw"].T                                        # (1, H)
    fcb = params["fcb"]                                              # (1, 1)

    # Explicit VMEM budget (default scoped limit is 16/32 MiB; cap at v7x's
    # 64 MiB physical).
    est = (2 * T * block_b * D * 2          # double-buffered bf16 x block
           + T * block_b * 4 * H * 4        # f32 xproj scratch
           + (D + H + 1) * 4 * H * 4        # weights + bias (upper bound)
           + 4 * block_b * 4 + (1 << 20))
    vmem_limit = int(min(max(2 * est, 32 * 1024 * 1024), 64 * 1024 * 1024))

    grid_spec = pltpu.PrefetchScalarGridSpec(
        num_scalar_prefetch=0,
        grid=(nb,),
        in_specs=[
            pl.BlockSpec((T, block_b, D), lambda bi: (0, bi, 0)),
            pl.BlockSpec((block_b, 1), lambda bi: (bi, 0)),
            pl.BlockSpec((D, 4 * H), lambda bi: (0, 0)),
            pl.BlockSpec((H, 4 * H), lambda bi: (0, 0)),
            pl.BlockSpec((1, 4 * H), lambda bi: (0, 0)),
            pl.BlockSpec((1, H), lambda bi: (0, 0)),
            pl.BlockSpec((1, 1), lambda bi: (0, 0)),
        ],
        out_specs=pl.BlockSpec((1, block_b), lambda bi: (bi, 0)),
        scratch_shapes=[pltpu.VMEM((T, block_b, 4 * H), jnp.float32)],
    )
    # TODO(synk): for long T / large D, chunk the sequence (memory_space=pl.ANY +
    # double-buffered make_async_copy) instead of keeping (T,BB,D)+(T,BB,4H)
    # VMEM-resident (matters most on v7x's 64 MiB VMEM), pass lengths via scalar
    # prefetch to pl.when-skip dead tail chunks, and mark the batch axis
    # pltpu.CORE_PARALLEL on v7x once nb >= 2.
    out = pl.pallas_call(
        _lstm_classifier_kernel,
        out_shape=jax.ShapeDtypeStruct((nb, block_b), jnp.float32),
        grid_spec=grid_spec,
        compiler_params=pltpu.CompilerParams(
            dimension_semantics=("parallel",),
            vmem_limit_bytes=vmem_limit),
    )(x_emb, len2d, wx, wh, b, fcw_row, fcb)
    return out.reshape(B_pad)[:B].reshape(B, 1)


def init_params(key, vocab, input_size, hidden_size):
    """Deterministic synthetic parameters (shapes match the PyTorch module)."""
    keys = jax.random.split(key, 16)
    D, H = input_size, hidden_size
    C = D + H

    def lin(kw, kb, n_in, n_out):
        # PyTorch nn.Linear(n_in, n_out): weight (n_out, n_in); stored transposed
        # (n_in, n_out) so the kernel does row-major x @ W.
        w = jax.random.uniform(kw, (n_out, n_in), jnp.float32, -0.1, 0.1)
        b = jax.random.uniform(kb, (1, n_out), jnp.float32, -0.1, 0.1)
        return w.T, b

    # Each LSTM gate Linear(C, H): split weight into x-part (D,H) and h-part (H,H)
    # (gate input is concat([x, h], dim=1)).
    def gate_params(kw, kb):
        w_t, b = lin(kw, kb, C, H)      # (C, H), (1, H)
        return w_t[:D, :], w_t[D:, :], b

    wxf, whf, bf = gate_params(keys[0], keys[1])
    wxi, whi, bi = gate_params(keys[2], keys[3])
    wxc, whc, bc = gate_params(keys[4], keys[5])
    wxo, who, bo = gate_params(keys[6], keys[7])
    fcw, fcb = lin(keys[8], keys[9], H, 1)          # (H, 1), (1, 1)
    embedding = jax.random.normal(keys[10], (vocab, D), jnp.float32)

    return dict(
        embedding=embedding,
        wxf=wxf, whf=whf, bf=bf,
        wxi=wxi, whi=whi, bi=bi,
        wxc=wxc, whc=whc, bc=bc,
        wxo=wxo, who=who, bo=bo,
        fcw=fcw, fcb=fcb,
    )


def reference_forward(tokens, lengths, params):
    """Pure-JAX f32 reference mirroring the PyTorch loop (sanity check)."""
    B, T = tokens.shape
    H = params["whf"].shape[0]
    x = jnp.take(params["embedding"], tokens, axis=0)  # (B, T, D)
    c = jnp.zeros((B, H), jnp.float32)
    h = jnp.zeros((B, H), jnp.float32)
    hidden_outputs = [h]
    for t in range(T):
        x_t = x[:, t, :]
        f = jax.nn.sigmoid(x_t @ params["wxf"] + h @ params["whf"] + params["bf"])
        i = jax.nn.sigmoid(x_t @ params["wxi"] + h @ params["whi"] + params["bi"])
        c_hat = jnp.tanh(x_t @ params["wxc"] + h @ params["whc"] + params["bc"])
        o = jax.nn.sigmoid(x_t @ params["wxo"] + h @ params["who"] + params["bo"])
        c = f * c + i * c_hat
        h = o * jnp.tanh(c)
        hidden_outputs.append(h)
    stacked = jnp.stack(hidden_outputs, axis=0)        # (T+1, B, H)
    last = stacked[lengths, jnp.arange(B)]             # (B, H)
    return jax.nn.sigmoid(last @ params["fcw"] + params["fcb"])


if __name__ == "__main__":
    B, T = 2, 8
    INPUT_SIZE, HIDDEN_SIZE, VOCAB = 16, 32, 14

    key = jax.random.PRNGKey(0)
    k_tok, k_len, k_par = jax.random.split(key, 3)

    tokens = jax.random.randint(k_tok, (B, T), 0, VOCAB, dtype=jnp.int32)
    lengths = jax.random.randint(k_len, (B,), 1, T + 1, dtype=jnp.int32)
    params = init_params(k_par, VOCAB, INPUT_SIZE, HIDDEN_SIZE)

    out = lstm_classifier_forward(tokens, lengths, params)
    out = jax.block_until_ready(out)

    ref = reference_forward(tokens, lengths, params)
    assert out.shape == (B, 1)
    # Tolerance loosened for bf16 MXU operands (f32 accumulation kept).
    assert jnp.allclose(out, ref, atol=1e-2, rtol=1e-2), (out, ref)

    print("KERNEL_OK")
</pallas_src>

<mosaic_0001>
module attributes {stable_mosaic.version = 11 : i64} {
  func.func @_lstm_classifier_kernel(%arg0: i32, %arg1: memref<8x8x16xbf16, #tpu.memory_space<vmem>>, %arg2: memref<8x1xi32, #tpu.memory_space<vmem>>, %arg3: memref<16x128xbf16, #tpu.memory_space<vmem>>, %arg4: memref<32x128xbf16, #tpu.memory_space<vmem>>, %arg5: memref<1x128xf32, #tpu.memory_space<vmem>>, %arg6: memref<1x32xf32, #tpu.memory_space<vmem>>, %arg7: memref<1x1xf32, #tpu.memory_space<vmem>>, %arg8: memref<1x8xf32, #tpu.memory_space<vmem>>, %arg9: memref<8x8x128xf32, #tpu.memory_space<vmem>>) attributes {dimension_semantics = [#tpu.dimension_semantics<parallel>], iteration_bounds = array<i64: 1>, scalar_prefetch = 0 : i64, scratch_operands = 1 : i64, tpu.core_type = #tpu.core_type<tc>, window_params = [{transform_indices = @transform_0, window_bounds = array<i64: 8, 8, 16>}, {transform_indices = @transform_1, window_bounds = array<i64: 8, 1>}, {pipeline_mode = #tpu.pipeline_mode<synchronous>, transform_indices = @transform_2, window_bounds = array<i64: 16, 128>}, {pipeline_mode = #tpu.pipeline_mode<synchronous>, transform_indices = @transform_3, window_bounds = array<i64: 32, 128>}, {pipeline_mode = #tpu.pipeline_mode<synchronous>, transform_indices = @transform_4, window_bounds = array<i64: 1, 128>}, {pipeline_mode = #tpu.pipeline_mode<synchronous>, transform_indices = @transform_5, window_bounds = array<i64: 1, 32>}, {pipeline_mode = #tpu.pipeline_mode<synchronous>, transform_indices = @transform_6, window_bounds = array<i64: 1, 1>}, {transform_indices = @transform_7, window_bounds = array<i64: 1, 8>}]} {
    %c0 = arith.constant 0 : index
    %c0_0 = arith.constant 0 : index
    %0 = vector.load %arg3[%c0, %c0_0] : memref<16x128xbf16, #tpu.memory_space<vmem>>, vector<16x128xbf16>
    %c0_1 = arith.constant 0 : index
    %c0_2 = arith.constant 0 : index
    %1 = vector.load %arg4[%c0_1, %c0_2] : memref<32x128xbf16, #tpu.memory_space<vmem>>, vector<32x128xbf16>
    %c0_3 = arith.constant 0 : index
    %c0_4 = arith.constant 0 : index
    %2 = vector.load %arg5[%c0_3, %c0_4] : memref<1x128xf32, #tpu.memory_space<vmem>>, vector<1x128xf32>
    %c0_5 = arith.constant 0 : index
    %c0_6 = arith.constant 0 : index
    %3 = vector.load %arg2[%c0_5, %c0_6] : memref<8x1xi32, #tpu.memory_space<vmem>>, vector<8x1xi32>
    %c0_7 = arith.constant 0 : index
    %c0_8 = arith.constant 0 : index
    %4 = vector.load %arg6[%c0_7, %c0_8] : memref<1x32xf32, #tpu.memory_space<vmem>>, vector<1x32xf32>
    %c0_9 = arith.constant 0 : index
    %c0_10 = arith.constant 0 : index
    %5 = vector.load %arg7[%c0_9, %c0_10] : memref<1x1xf32, #tpu.memory_space<vmem>>, vector<1x1xf32>
    %c0_i32 = arith.constant 0 : i32
    %6 = arith.index_cast %c0_i32 : i32 to index
    %c0_11 = arith.constant 0 : index
    %c0_12 = arith.constant 0 : index
    %7 = vector.load %arg1[%6, %c0_11, %c0_12] : memref<8x8x16xbf16, #tpu.memory_space<vmem>>, vector<1x8x16xbf16>
    %8 = vector.shape_cast %7 : vector<1x8x16xbf16> to vector<8x16xbf16>
    %cst = arith.constant dense<0.000000e+00> : vector<8x128xf32>
    %9 = tpu.matmul %8, %0, %cst {dimension_numbers = #tpu.dot_dimension_numbers<[1], [0], [0], [1], [0, 0, 1, 1], [], []>} : vector<8x16xbf16>, vector<16x128xbf16>, vector<8x128xf32> -> vector<8x128xf32>
    %10 = vector.broadcast %2 : vector<1x128xf32> to vector<8x128xf32>
    %11 = arith.addf %9, %10 : vector<8x128xf32>
    %12 = arith.index_cast %c0_i32 : i32 to index
    %c0_13 = arith.constant 0 : index
    %c0_14 = arith.constant 0 : index
    %13 = vector.load %arg9[%12, %c0_13, %c0_14] : memref<8x8x128xf32, #tpu.memory_space<vmem>>, vector<1x8x128xf32>
    %14 = vector.shape_cast %13 : vector<1x8x128xf32> to vector<8x128xf32>
    %15 = vector.shape_cast %11 : vector<8x128xf32> to vector<1x8x128xf32>
    tpu.vector_store %arg9[%12, %c0_13, %c0_14], %15 {strides = array<i32>} : memref<8x8x128xf32, #tpu.memory_space<vmem>>, vector<1x8x128xf32>,
    %c1_i32 = arith.constant 1 : i32
    %16 = arith.index_cast %c1_i32 : i32 to index
    %c0_15 = arith.constant 0 : index
    %c0_16 = arith.constant 0 : index
    %17 = vector.load %arg1[%16, %c0_15, %c0_16] : memref<8x8x16xbf16, #tpu.memory_space<vmem>>, vector<1x8x16xbf16>
    %18 = vector.shape_cast %17 : vector<1x8x16xbf16> to vector<8x16xbf16>
    %cst_17 = arith.constant dense<0.000000e+00> : vector<8x128xf32>
    %19 = tpu.matmul %18, %0, %cst_17 {dimension_numbers = #tpu.dot_dimension_numbers<[1], [0], [0], [1], [0, 0, 1, 1], [], []>} : vector<8x16xbf16>, vector<16x128xbf16>, vector<8x128xf32> -> vector<8x128xf32>
    %20 = vector.broadcast %2 : vector<1x128xf32> to vector<8x128xf32>
    %21 = arith.addf %19, %20 : vector<8x128xf32>
    %22 = arith.index_cast %c1_i32 : i32 to index
    %c0_18 = arith.constant 0 : index
    %c0_19 = arith.constant 0 : index
    %23 = vector.load %arg9[%22, %c0_18, %c0_19] : memref<8x8x128xf32, #tpu.memory_space<vmem>>, vector<1x8x128xf32>
    %24 = vector.shape_cast %23 : vector<1x8x128xf32> to vector<8x128xf32>
    %25 = vector.shape_cast %21 : vector<8x128xf32> to vector<1x8x128xf32>
    tpu.vector_store %arg9[%22, %c0_18, %c0_19], %25 {strides = array<i32>} : memref<8x8x128xf32, #tpu.memory_space<vmem>>, vector<1x8x128xf32>,
    %c2_i32 = arith.constant 2 : i32
    %26 = arith.index_cast %c2_i32 : i32 to index
    %c0_20 = arith.constant 0 : index
    %c0_21 = arith.constant 0 : index
    %27 = vector.load %arg1[%26, %c0_20, %c0_21] : memref<8x8x16xbf16, #tpu.memory_space<vmem>>, vector<1x8x16xbf16>
    %28 = vector.shape_cast %27 : vector<1x8x16xbf16> to vector<8x16xbf16>
    %cst_22 = arith.constant dense<0.000000e+00> : vector<8x128xf32>
    %29 = tpu.matmul %28, %0, %cst_22 {dimension_numbers = #tpu.dot_dimension_numbers<[1], [0], [0], [1], [0, 0, 1, 1], [], []>} : vector<8x16xbf16>, vector<16x128xbf16>, vector<8x128xf32> -> vector<8x128xf32>
    %30 = vector.broadcast %2 : vector<1x128xf32> to vector<8x128xf32>
    %31 = arith.addf %29, %30 : vector<8x128xf32>
    %32 = arith.index_cast %c2_i32 : i32 to index
    %c0_23 = arith.constant 0 : index
    %c0_24 = arith.constant 0 : index
    %33 = vector.load %arg9[%32, %c0_23, %c0_24] : memref<8x8x128xf32, #tpu.memory_space<vmem>>, vector<1x8x128xf32>
    %34 = vector.shape_cast %33 : vector<1x8x128xf32> to vector<8x128xf32>
    %35 = vector.shape_cast %31 : vector<8x128xf32> to vector<1x8x128xf32>
    tpu.vector_store %arg9[%32, %c0_23, %c0_24], %35 {strides = array<i32>} : memref<8x8x128xf32, #tpu.memory_space<vmem>>, vector<1x8x128xf32>,
    %c3_i32 = arith.constant 3 : i32
    %36 = arith.index_cast %c3_i32 : i32 to index
    %c0_25 = arith.constant 0 : index
    %c0_26 = arith.constant 0 : index
    %37 = vector.load %arg1[%36, %c0_25, %c0_26] : memref<8x8x16xbf16, #tpu.memory_space<vmem>>, vector<1x8x16xbf16>
    %38 = vector.shape_cast %37 : vector<1x8x16xbf16> to vector<8x16xbf16>
    %cst_27 = arith.constant dense<0.000000e+00> : vector<8x128xf32>
    %39 = tpu.matmul %38, %0, %cst_27 {dimension_numbers = #tpu.dot_dimension_numbers<[1], [0], [0], [1], [0, 0, 1, 1], [], []>} : vector<8x16xbf16>, vector<16x128xbf16>, vector<8x128xf32> -> vector<8x128xf32>
    %40 = vector.broadcast %2 : vector<1x128xf32> to vector<8x128xf32>
    %41 = arith.addf %39, %40 : vector<8x128xf32>
    %42 = arith.index_cast %c3_i32 : i32 to index
    %c0_28 = arith.constant 0 : index
    %c0_29 = arith.constant 0 : index
    %43 = vector.load %arg9[%42, %c0_28, %c0_29] : memref<8x8x128xf32, #tpu.memory_space<vmem>>, vector<1x8x128xf32>
    %44 = vector.shape_cast %43 : vector<1x8x128xf32> to vector<8x128xf32>
    %45 = vector.shape_cast %41 : vector<8x128xf32> to vector<1x8x128xf32>
    tpu.vector_store %arg9[%42, %c0_28, %c0_29], %45 {strides = array<i32>} : memref<8x8x128xf32, #tpu.memory_space<vmem>>, vector<1x8x128xf32>,
    %c4_i32 = arith.constant 4 : i32
    %46 = arith.index_cast %c4_i32 : i32 to index
    %c0_30 = arith.constant 0 : index
    %c0_31 = arith.constant 0 : index
    %47 = vector.load %arg1[%46, %c0_30, %c0_31] : memref<8x8x16xbf16, #tpu.memory_space<vmem>>, vector<1x8x16xbf16>
    %48 = vector.shape_cast %47 : vector<1x8x16xbf16> to vector<8x16xbf16>
    %cst_32 = arith.constant dense<0.000000e+00> : vector<8x128xf32>
    %49 = tpu.matmul %48, %0, %cst_32 {dimension_numbers = #tpu.dot_dimension_numbers<[1], [0], [0], [1], [0, 0, 1, 1], [], []>} : vector<8x16xbf16>, vector<16x128xbf16>, vector<8x128xf32> -> vector<8x128xf32>
    %50 = vector.broadcast %2 : vector<1x128xf32> to vector<8x128xf32>
    %51 = arith.addf %49, %50 : vector<8x128xf32>
    %52 = arith.index_cast %c4_i32 : i32 to index
    %c0_33 = arith.constant 0 : index
    %c0_34 = arith.constant 0 : index
    %53 = vector.load %arg9[%52, %c0_33, %c0_34] : memref<8x8x128xf32, #tpu.memory_space<vmem>>, vector<1x8x128xf32>
    %54 = vector.shape_cast %53 : vector<1x8x128xf32> to vector<8x128xf32>
    %55 = vector.shape_cast %51 : vector<8x128xf32> to vector<1x8x128xf32>
    tpu.vector_store %arg9[%52, %c0_33, %c0_34], %55 {strides = array<i32>} : memref<8x8x128xf32, #tpu.memory_space<vmem>>, vector<1x8x128xf32>,
    %c5_i32 = arith.constant 5 : i32
    %56 = arith.index_cast %c5_i32 : i32 to index
    %c0_35 = arith.constant 0 : index
    %c0_36 = arith.constant 0 : index
    %57 = vector.load %arg1[%56, %c0_35, %c0_36] : memref<8x8x16xbf16, #tpu.memory_space<vmem>>, vector<1x8x16xbf16>
    %58 = vector.shape_cast %57 : vector<1x8x16xbf16> to vector<8x16xbf16>
    %cst_37 = arith.constant dense<0.000000e+00> : vector<8x128xf32>
    %59 = tpu.matmul %58, %0, %cst_37 {dimension_numbers = #tpu.dot_dimension_numbers<[1], [0], [0], [1], [0, 0, 1, 1], [], []>} : vector<8x16xbf16>, vector<16x128xbf16>, vector<8x128xf32> -> vector<8x128xf32>
    %60 = vector.broadcast %2 : vector<1x128xf32> to vector<8x128xf32>
    %61 = arith.addf %59, %60 : vector<8x128xf32>
    %62 = arith.index_cast %c5_i32 : i32 to index
    %c0_38 = arith.constant 0 : index
    %c0_39 = arith.constant 0 : index
    %63 = vector.load %arg9[%62, %c0_38, %c0_39] : memref<8x8x128xf32, #tpu.memory_space<vmem>>, vector<1x8x128xf32>
    %64 = vector.shape_cast %63 : vector<1x8x128xf32> to vector<8x128xf32>
    %65 = vector.shape_cast %61 : vector<8x128xf32> to vector<1x8x128xf32>
    tpu.vector_store %arg9[%62, %c0_38, %c0_39], %65 {strides = array<i32>} : memref<8x8x128xf32, #tpu.memory_space<vmem>>, vector<1x8x128xf32>,
    %c6_i32 = arith.constant 6 : i32
    %66 = arith.index_cast %c6_i32 : i32 to index
    %c0_40 = arith.constant 0 : index
    %c0_41 = arith.constant 0 : index
    %67 = vector.load %arg1[%66, %c0_40, %c0_41] : memref<8x8x16xbf16, #tpu.memory_space<vmem>>, vector<1x8x16xbf16>
    %68 = vector.shape_cast %67 : vector<1x8x16xbf16> to vector<8x16xbf16>
    %cst_42 = arith.constant dense<0.000000e+00> : vector<8x128xf32>
    %69 = tpu.matmul %68, %0, %cst_42 {dimension_numbers = #tpu.dot_dimension_numbers<[1], [0], [0], [1], [0, 0, 1, 1], [], []>} : vector<8x16xbf16>, vector<16x128xbf16>, vector<8x128xf32> -> vector<8x128xf32>
    %70 = vector.broadcast %2 : vector<1x128xf32> to vector<8x128xf32>
    %71 = arith.addf %69, %70 : vector<8x128xf32>
    %72 = arith.index_cast %c6_i32 : i32 to index
    %c0_43 = arith.constant 0 : index
    %c0_44 = arith.constant 0 : index
    %73 = vector.load %arg9[%72, %c0_43, %c0_44] : memref<8x8x128xf32, #tpu.memory_space<vmem>>, vector<1x8x128xf32>
    %74 = vector.shape_cast %73 : vector<1x8x128xf32> to vector<8x128xf32>
    %75 = vector.shape_cast %71 : vector<8x128xf32> to vector<1x8x128xf32>
    tpu.vector_store %arg9[%72, %c0_43, %c0_44], %75 {strides = array<i32>} : memref<8x8x128xf32, #tpu.memory_space<vmem>>, vector<1x8x128xf32>,
    %c7_i32 = arith.constant 7 : i32
    %76 = arith.index_cast %c7_i32 : i32 to index
    %c0_45 = arith.constant 0 : index
    %c0_46 = arith.constant 0 : index
    %77 = vector.load %arg1[%76, %c0_45, %c0_46] : memref<8x8x16xbf16, #tpu.memory_space<vmem>>, vector<1x8x16xbf16>
    %78 = vector.shape_cast %77 : vector<1x8x16xbf16> to vector<8x16xbf16>
    %cst_47 = arith.constant dense<0.000000e+00> : vector<8x128xf32>
    %79 = tpu.matmul %78, %0, %cst_47 {dimension_numbers = #tpu.dot_dimension_numbers<[1], [0], [0], [1], [0, 0, 1, 1], [], []>} : vector<8x16xbf16>, vector<16x128xbf16>, vector<8x128xf32> -> vector<8x128xf32>
    %80 = vector.broadcast %2 : vector<1x128xf32> to vector<8x128xf32>
    %81 = arith.addf %79, %80 : vector<8x128xf32>
    %82 = arith.index_cast %c7_i32 : i32 to index
    %c0_48 = arith.constant 0 : index
    %c0_49 = arith.constant 0 : index
    %83 = vector.load %arg9[%82, %c0_48, %c0_49] : memref<8x8x128xf32, #tpu.memory_space<vmem>>, vector<1x8x128xf32>
    %84 = vector.shape_cast %83 : vector<1x8x128xf32> to vector<8x128xf32>
    %85 = vector.shape_cast %81 : vector<8x128xf32> to vector<1x8x128xf32>
    tpu.vector_store %arg9[%82, %c0_48, %c0_49], %85 {strides = array<i32>} : memref<8x8x128xf32, #tpu.memory_space<vmem>>, vector<1x8x128xf32>,
    %c8_i32 = arith.constant 8 : i32
    %cst_50 = arith.constant 0.000000e+00 : f32
    %86 = vector.broadcast %cst_50 : f32 to vector<8x32xf32>
    %c0_i32_51 = arith.constant 0 : i32
    %87 = arith.index_cast %c0_i32_51 : i32 to index
    %c0_52 = arith.constant 0 : index
    %c0_53 = arith.constant 0 : index
    %88 = vector.load %arg9[%87, %c0_52, %c0_53] : memref<8x8x128xf32, #tpu.memory_space<vmem>>, vector<1x8x128xf32>
    %89 = vector.shape_cast %88 : vector<1x8x128xf32> to vector<8x128xf32>
    %90 = arith.truncf %86 : vector<8x32xf32> to vector<8x32xbf16>
    %cst_54 = arith.constant dense<0.000000e+00> : vector<8x128xf32>
    %91 = tpu.matmul %90, %1, %cst_54 {dimension_numbers = #tpu.dot_dimension_numbers<[1], [0], [0], [1], [0, 0, 1, 1], [], []>} : vector<8x32xbf16>, vector<32x128xbf16>, vector<8x128xf32> -> vector<8x128xf32>
    %92 = arith.addf %89, %91 : vector<8x128xf32>
    %93 = vector.extract_strided_slice %92 {offsets = [0, 0], sizes = [8, 96], strides = [1, 1]} : vector<8x128xf32> to vector<8x96xf32>
    %94 = arith.negf %93 : vector<8x96xf32>
    %95 = math.exp %94 : vector<8x96xf32>
    %cst_55 = arith.constant 1.000000e+00 : f32
    %96 = vector.broadcast %cst_55 : f32 to vector<8x96xf32>
    %97 = arith.addf %96, %95 : vector<8x96xf32>
    %98 = arith.divf %96, %97 : vector<8x96xf32>
    %99 = vector.extract_strided_slice %98 {offsets = [0, 0], sizes = [8, 32], strides = [1, 1]} : vector<8x96xf32> to vector<8x32xf32>
    %100 = vector.extract_strided_slice %98 {offsets = [0, 32], sizes = [8, 32], strides = [1, 1]} : vector<8x96xf32> to vector<8x32xf32>
    %101 = vector.extract_strided_slice %98 {offsets = [0, 64], sizes = [8, 32], strides = [1, 1]} : vector<8x96xf32> to vector<8x32xf32>
    %102 = vector.extract_strided_slice %92 {offsets = [0, 96], sizes = [8, 32], strides = [1, 1]} : vector<8x128xf32> to vector<8x32xf32>
    %103 = math.tanh %102 : vector<8x32xf32>
    %104 = arith.mulf %99, %86 : vector<8x32xf32>
    %105 = arith.mulf %100, %103 : vector<8x32xf32>
    %106 = arith.addf %104, %105 : vector<8x32xf32>
    %107 = math.tanh %106 : vector<8x32xf32>
    %108 = arith.mulf %101, %107 : vector<8x32xf32>
    %c1_i32_56 = arith.constant 1 : i32
    %109 = arith.addi %c0_i32_51, %c1_i32_56 : i32
    %110 = vector.broadcast %109 : i32 to vector<8x1xi32>
    %111 = arith.cmpi eq, %3, %110 : vector<8x1xi32>
    %112 = vector.shape_cast %111 : vector<8x1xi1> to vector<8x1xi1>
    %113 = vector.broadcast %112 : vector<8x1xi1> to vector<8x32xi1>
    %114 = arith.select %113, %108, %86 : vector<8x32xi1>, vector<8x32xf32>
    %c1_i32_57 = arith.constant 1 : i32
    %115 = arith.index_cast %c1_i32_57 : i32 to index
    %c0_58 = arith.constant 0 : index
    %c0_59 = arith.constant 0 : index
    %116 = vector.load %arg9[%115, %c0_58, %c0_59] : memref<8x8x128xf32, #tpu.memory_space<vmem>>, vector<1x8x128xf32>
    %117 = vector.shape_cast %116 : vector<1x8x128xf32> to vector<8x128xf32>
    %118 = arith.truncf %108 : vector<8x32xf32> to vector<8x32xbf16>
    %cst_60 = arith.constant dense<0.000000e+00> : vector<8x128xf32>
    %119 = tpu.matmul %118, %1, %cst_60 {dimension_numbers = #tpu.dot_dimension_numbers<[1], [0], [0], [1], [0, 0, 1, 1], [], []>} : vector<8x32xbf16>, vector<32x128xbf16>, vector<8x128xf32> -> vector<8x128xf32>
    %120 = arith.addf %117, %119 : vector<8x128xf32>
    %121 = vector.extract_strided_slice %120 {offsets = [0, 0], sizes = [8, 96], strides = [1, 1]} : vector<8x128xf32> to vector<8x96xf32>
    %122 = arith.negf %121 : vector<8x96xf32>
    %123 = math.exp %122 : vector<8x96xf32>
    %cst_61 = arith.constant 1.000000e+00 : f32
    %124 = vector.broadcast %cst_61 : f32 to vector<8x96xf32>
    %125 = arith.addf %124, %123 : vector<8x96xf32>
    %126 = arith.divf %124, %125 : vector<8x96xf32>
    %127 = vector.extract_strided_slice %126 {offsets = [0, 0], sizes = [8, 32], strides = [1, 1]} : vector<8x96xf32> to vector<8x32xf32>
    %128 = vector.extract_strided_slice %126 {offsets = [0, 32], sizes = [8, 32], strides = [1, 1]} : vector<8x96xf32> to vector<8x32xf32>
    %129 = vector.extract_strided_slice %126 {offsets = [0, 64], sizes = [8, 32], strides = [1, 1]} : vector<8x96xf32> to vector<8x32xf32>
    %130 = vector.extract_strided_slice %120 {offsets = [0, 96], sizes = [8, 32], strides = [1, 1]} : vector<8x128xf32> to vector<8x32xf32>
    %131 = math.tanh %130 : vector<8x32xf32>
    %132 = arith.mulf %127, %106 : vector<8x32xf32>
    %133 = arith.mulf %128, %131 : vector<8x32xf32>
    %134 = arith.addf %132, %133 : vector<8x32xf32>
    %135 = math.tanh %134 : vector<8x32xf32>
    %136 = arith.mulf %129, %135 : vector<8x32xf32>
    %c1_i32_62 = arith.constant 1 : i32
    %137 = arith.addi %c1_i32_57, %c1_i32_62 : i32
    %138 = vector.broadcast %137 : i32 to vector<8x1xi32>
    %139 = arith.cmpi eq, %3, %138 : vector<8x1xi32>
    %140 = vector.shape_cast %139 : vector<8x1xi1> to vector<8x1xi1>
    %141 = vector.broadcast %140 : vector<8x1xi1> to vector<8x32xi1>
    %142 = arith.select %141, %136, %114 : vector<8x32xi1>, vector<8x32xf32>
    %c2_i32_63 = arith.constant 2 : i32
    %143 = arith.index_cast %c2_i32_63 : i32 to index
    %c0_64 = arith.constant 0 : index
    %c0_65 = arith.constant 0 : index
    %144 = vector.load %arg9[%143, %c0_64, %c0_65] : memref<8x8x128xf32, #tpu.memory_space<vmem>>, vector<1x8x128xf32>
    %145 = vector.shape_cast %144 : vector<1x8x128xf32> to vector<8x128xf32>
    %146 = arith.truncf %136 : vector<8x32xf32> to vector<8x32xbf16>
    %cst_66 = arith.constant dense<0.000000e+00> : vector<8x128xf32>
    %147 = tpu.matmul %146, %1, %cst_66 {dimension_numbers = #tpu.dot_dimension_numbers<[1], [0], [0], [1], [0, 0, 1, 1], [], []>} : vector<8x32xbf16>, vector<32x128xbf16>, vector<8x128xf32> -> vector<8x128xf32>
    %148 = arith.addf %145, %147 : vector<8x128xf32>
    %149 = vector.extract_strided_slice %148 {offsets = [0, 0], sizes = [8, 96], strides = [1, 1]} : vector<8x128xf32> to vector<8x96xf32>
    %150 = arith.negf %149 : vector<8x96xf32>
    %151 = math.exp %150 : vector<8x96xf32>
    %cst_67 = arith.constant 1.000000e+00 : f32
    %152 = vector.broadcast %cst_67 : f32 to vector<8x96xf32>
    %153 = arith.addf %152, %151 : vector<8x96xf32>
    %154 = arith.divf %152, %153 : vector<8x96xf32>
    %155 = vector.extract_strided_slice %154 {offsets = [0, 0], sizes = [8, 32], strides = [1, 1]} : vector<8x96xf32> to vector<8x32xf32>
    %156 = vector.extract_strided_slice %154 {offsets = [0, 32], sizes = [8, 32], strides = [1, 1]} : vector<8x96xf32> to vector<8x32xf32>
    %157 = vector.extract_strided_slice %154 {offsets = [0, 64], sizes = [8, 32], strides = [1, 1]} : vector<8x96xf32> to vector<8x32xf32>
    %158 = vector.extract_strided_slice %148 {offsets = [0, 96], sizes = [8, 32], strides = [1, 1]} : vector<8x128xf32> to vector<8x32xf32>
    %159 = math.tanh %158 : vector<8x32xf32>
    %160 = arith.mulf %155, %134 : vector<8x32xf32>
    %161 = arith.mulf %156, %159 : vector<8x32xf32>
    %162 = arith.addf %160, %161 : vector<8x32xf32>
    %163 = math.tanh %162 : vector<8x32xf32>
    %164 = arith.mulf %157, %163 : vector<8x32xf32>
    %c1_i32_68 = arith.constant 1 : i32
    %165 = arith.addi %c2_i32_63, %c1_i32_68 : i32
    %166 = vector.broadcast %165 : i32 to vector<8x1xi32>
    %167 = arith.cmpi eq, %3, %166 : vector<8x1xi32>
    %168 = vector.shape_cast %167 : vector<8x1xi1> to vector<8x1xi1>
    %169 = vector.broadcast %168 : vector<8x1xi1> to vector<8x32xi1>
    %170 = arith.select %169, %164, %142 : vector<8x32xi1>, vector<8x32xf32>
    %c3_i32_69 = arith.constant 3 : i32
    %171 = arith.index_cast %c3_i32_69 : i32 to index
    %c0_70 = arith.constant 0 : index
    %c0_71 = arith.constant 0 : index
    %172 = vector.load %arg9[%171, %c0_70, %c0_71] : memref<8x8x128xf32, #tpu.memory_space<vmem>>, vector<1x8x128xf32>
    %173 = vector.shape_cast %172 : vector<1x8x128xf32> to vector<8x128xf32>
    %174 = arith.truncf %164 : vector<8x32xf32> to vector<8x32xbf16>
    %cst_72 = arith.constant dense<0.000000e+00> : vector<8x128xf32>
    %175 = tpu.matmul %174, %1, %cst_72 {dimension_numbers = #tpu.dot_dimension_numbers<[1], [0], [0], [1], [0, 0, 1, 1], [], []>} : vector<8x32xbf16>, vector<32x128xbf16>, vector<8x128xf32> -> vector<8x128xf32>
    %176 = arith.addf %173, %175 : vector<8x128xf32>
    %177 = vector.extract_strided_slice %176 {offsets = [0, 0], sizes = [8, 96], strides = [1, 1]} : vector<8x128xf32> to vector<8x96xf32>
    %178 = arith.negf %177 : vector<8x96xf32>
    %179 = math.exp %178 : vector<8x96xf32>
    %cst_73 = arith.constant 1.000000e+00 : f32
    %180 = vector.broadcast %cst_73 : f32 to vector<8x96xf32>
    %181 = arith.addf %180, %179 : vector<8x96xf32>
    %182 = arith.divf %180, %181 : vector<8x96xf32>
    %183 = vector.extract_strided_slice %182 {offsets = [0, 0], sizes = [8, 32], strides = [1, 1]} : vector<8x96xf32> to vector<8x32xf32>
    %184 = vector.extract_strided_slice %182 {offsets = [0, 32], sizes = [8, 32], strides = [1, 1]} : vector<8x96xf32> to vector<8x32xf32>
    %185 = vector.extract_strided_slice %182 {offsets = [0, 64], sizes = [8, 32], strides = [1, 1]} : vector<8x96xf32> to vector<8x32xf32>
    %186 = vector.extract_strided_slice %176 {offsets = [0, 96], sizes = [8, 32], strides = [1, 1]} : vector<8x128xf32> to vector<8x32xf32>
    %187 = math.tanh %186 : vector<8x32xf32>
    %188 = arith.mulf %183, %162 : vector<8x32xf32>
    %189 = arith.mulf %184, %187 : vector<8x32xf32>
    %190 = arith.addf %188, %189 : vector<8x32xf32>
    %191 = math.tanh %190 : vector<8x32xf32>
    %192 = arith.mulf %185, %191 : vector<8x32xf32>
    %c1_i32_74 = arith.constant 1 : i32
    %193 = arith.addi %c3_i32_69, %c1_i32_74 : i32
    %194 = vector.broadcast %193 : i32 to vector<8x1xi32>
    %195 = arith.cmpi eq, %3, %194 : vector<8x1xi32>
    %196 = vector.shape_cast %195 : vector<8x1xi1> to vector<8x1xi1>
    %197 = vector.broadcast %196 : vector<8x1xi1> to vector<8x32xi1>
    %198 = arith.select %197, %192, %170 : vector<8x32xi1>, vector<8x32xf32>
    %c4_i32_75 = arith.constant 4 : i32
    %199 = arith.index_cast %c4_i32_75 : i32 to index
    %c0_76 = arith.constant 0 : index
    %c0_77 = arith.constant 0 : index
    %200 = vector.load %arg9[%199, %c0_76, %c0_77] : memref<8x8x128xf32, #tpu.memory_space<vmem>>, vector<1x8x128xf32>
    %201 = vector.shape_cast %200 : vector<1x8x128xf32> to vector<8x128xf32>
    %202 = arith.truncf %192 : vector<8x32xf32> to vector<8x32xbf16>
    %cst_78 = arith.constant dense<0.000000e+00> : vector<8x128xf32>
    %203 = tpu.matmul %202, %1, %cst_78 {dimension_numbers = #tpu.dot_dimension_numbers<[1], [0], [0], [1], [0, 0, 1, 1], [], []>} : vector<8x32xbf16>, vector<32x128xbf16>, vector<8x128xf32> -> vector<8x128xf32>
    %204 = arith.addf %201, %203 : vector<8x128xf32>
    %205 = vector.extract_strided_slice %204 {offsets = [0, 0], sizes = [8, 96], strides = [1, 1]} : vector<8x128xf32> to vector<8x96xf32>
    %206 = arith.negf %205 : vector<8x96xf32>
    %207 = math.exp %206 : vector<8x96xf32>
    %cst_79 = arith.constant 1.000000e+00 : f32
    %208 = vector.broadcast %cst_79 : f32 to vector<8x96xf32>
    %209 = arith.addf %208, %207 : vector<8x96xf32>
    %210 = arith.divf %208, %209 : vector<8x96xf32>
    %211 = vector.extract_strided_slice %210 {offsets = [0, 0], sizes = [8, 32], strides = [1, 1]} : vector<8x96xf32> to vector<8x32xf32>
    %212 = vector.extract_strided_slice %210 {offsets = [0, 32], sizes = [8, 32], strides = [1, 1]} : vector<8x96xf32> to vector<8x32xf32>
    %213 = vector.extract_strided_slice %210 {offsets = [0, 64], sizes = [8, 32], strides = [1, 1]} : vector<8x96xf32> to vector<8x32xf32>
    %214 = vector.extract_strided_slice %204 {offsets = [0, 96], sizes = [8, 32], strides = [1, 1]} : vector<8x128xf32> to vector<8x32xf32>
    %215 = math.tanh %214 : vector<8x32xf32>
    %216 = arith.mulf %211, %190 : vector<8x32xf32>
    %217 = arith.mulf %212, %215 : vector<8x32xf32>
    %218 = arith.addf %216, %217 : vector<8x32xf32>
    %219 = math.tanh %218 : vector<8x32xf32>
    %220 = arith.mulf %213, %219 : vector<8x32xf32>
    %c1_i32_80 = arith.constant 1 : i32
    %221 = arith.addi %c4_i32_75, %c1_i32_80 : i32
    %222 = vector.broadcast %221 : i32 to vector<8x1xi32>
    %223 = arith.cmpi eq, %3, %222 : vector<8x1xi32>
    %224 = vector.shape_cast %223 : vector<8x1xi1> to vector<8x1xi1>
    %225 = vector.broadcast %224 : vector<8x1xi1> to vector<8x32xi1>
    %226 = arith.select %225, %220, %198 : vector<8x32xi1>, vector<8x32xf32>
    %c5_i32_81 = arith.constant 5 : i32
    %227 = arith.index_cast %c5_i32_81 : i32 to index
    %c0_82 = arith.constant 0 : index
    %c0_83 = arith.constant 0 : index
    %228 = vector.load %arg9[%227, %c0_82, %c0_83] : memref<8x8x128xf32, #tpu.memory_space<vmem>>, vector<1x8x128xf32>
    %229 = vector.shape_cast %228 : vector<1x8x128xf32> to vector<8x128xf32>
    %230 = arith.truncf %220 : vector<8x32xf32> to vector<8x32xbf16>
    %cst_84 = arith.constant dense<0.000000e+00> : vector<8x128xf32>
    %231 = tpu.matmul %230, %1, %cst_84 {dimension_numbers = #tpu.dot_dimension_numbers<[1], [0], [0], [1], [0, 0, 1, 1], [], []>} : vector<8x32xbf16>, vector<32x128xbf16>, vector<8x128xf32> -> vector<8x128xf32>
    %232 = arith.addf %229, %231 : vector<8x128xf32>
    %233 = vector.extract_strided_slice %232 {offsets = [0, 0], sizes = [8, 96], strides = [1, 1]} : vector<8x128xf32> to vector<8x96xf32>
    %234 = arith.negf %233 : vector<8x96xf32>
    %235 = math.exp %234 : vector<8x96xf32>
    %cst_85 = arith.constant 1.000000e+00 : f32
    %236 = vector.broadcast %cst_85 : f32 to vector<8x96xf32>
    %237 = arith.addf %236, %235 : vector<8x96xf32>
    %238 = arith.divf %236, %237 : vector<8x96xf32>
    %239 = vector.extract_strided_slice %238 {offsets = [0, 0], sizes = [8, 32], strides = [1, 1]} : vector<8x96xf32> to vector<8x32xf32>
    %240 = vector.extract_strided_slice %238 {offsets = [0, 32], sizes = [8, 32], strides = [1, 1]} : vector<8x96xf32> to vector<8x32xf32>
    %241 = vector.extract_strided_slice %238 {offsets = [0, 64], sizes = [8, 32], strides = [1, 1]} : vector<8x96xf32> to vector<8x32xf32>
    %242 = vector.extract_strided_slice %232 {offsets = [0, 96], sizes = [8, 32], strides = [1, 1]} : vector<8x128xf32> to vector<8x32xf32>
    %243 = math.tanh %242 : vector<8x32xf32>
    %244 = arith.mulf %239, %218 : vector<8x32xf32>
    %245 = arith.mulf %240, %243 : vector<8x32xf32>
    %246 = arith.addf %244, %245 : vector<8x32xf32>
    %247 = math.tanh %246 : vector<8x32xf32>
    %248 = arith.mulf %241, %247 : vector<8x32xf32>
    %c1_i32_86 = arith.constant 1 : i32
    %249 = arith.addi %c5_i32_81, %c1_i32_86 : i32
    %250 = vector.broadcast %249 : i32 to vector<8x1xi32>
    %251 = arith.cmpi eq, %3, %250 : vector<8x1xi32>
    %252 = vector.shape_cast %251 : vector<8x1xi1> to vector<8x1xi1>
    %253 = vector.broadcast %252 : vector<8x1xi1> to vector<8x32xi1>
    %254 = arith.select %253, %248, %226 : vector<8x32xi1>, vector<8x32xf32>
    %c6_i32_87 = arith.constant 6 : i32
    %255 = arith.index_cast %c6_i32_87 : i32 to index
    %c0_88 = arith.constant 0 : index
    %c0_89 = arith.constant 0 : index
    %256 = vector.load %arg9[%255, %c0_88, %c0_89] : memref<8x8x128xf32, #tpu.memory_space<vmem>>, vector<1x8x128xf32>
    %257 = vector.shape_cast %256 : vector<1x8x128xf32> to vector<8x128xf32>
    %258 = arith.truncf %248 : vector<8x32xf32> to vector<8x32xbf16>
    %cst_90 = arith.constant dense<0.000000e+00> : vector<8x128xf32>
    %259 = tpu.matmul %258, %1, %cst_90 {dimension_numbers = #tpu.dot_dimension_numbers<[1], [0], [0], [1], [0, 0, 1, 1], [], []>} : vector<8x32xbf16>, vector<32x128xbf16>, vector<8x128xf32> -> vector<8x128xf32>
    %260 = arith.addf %257, %259 : vector<8x128xf32>
    %261 = vector.extract_strided_slice %260 {offsets = [0, 0], sizes = [8, 96], strides = [1, 1]} : vector<8x128xf32> to vector<8x96xf32>
    %262 = arith.negf %261 : vector<8x96xf32>
    %263 = math.exp %262 : vector<8x96xf32>
    %cst_91 = arith.constant 1.000000e+00 : f32
    %264 = vector.broadcast %cst_91 : f32 to vector<8x96xf32>
    %265 = arith.addf %264, %263 : vector<8x96xf32>
    %266 = arith.divf %264, %265 : vector<8x96xf32>
    %267 = vector.extract_strided_slice %266 {offsets = [0, 0], sizes = [8, 32], strides = [1, 1]} : vector<8x96xf32> to vector<8x32xf32>
    %268 = vector.extract_strided_slice %266 {offsets = [0, 32], sizes = [8, 32], strides = [1, 1]} : vector<8x96xf32> to vector<8x32xf32>
    %269 = vector.extract_strided_slice %266 {offsets = [0, 64], sizes = [8, 32], strides = [1, 1]} : vector<8x96xf32> to vector<8x32xf32>
    %270 = vector.extract_strided_slice %260 {offsets = [0, 96], sizes = [8, 32], strides = [1, 1]} : vector<8x128xf32> to vector<8x32xf32>
    %271 = math.tanh %270 : vector<8x32xf32>
    %272 = arith.mulf %267, %246 : vector<8x32xf32>
    %273 = arith.mulf %268, %271 : vector<8x32xf32>
    %274 = arith.addf %272, %273 : vector<8x32xf32>
    %275 = math.tanh %274 : vector<8x32xf32>
    %276 = arith.mulf %269, %275 : vector<8x32xf32>
    %c1_i32_92 = arith.constant 1 : i32
    %277 = arith.addi %c6_i32_87, %c1_i32_92 : i32
    %278 = vector.broadcast %277 : i32 to vector<8x1xi32>
    %279 = arith.cmpi eq, %3, %278 : vector<8x1xi32>
    %280 = vector.shape_cast %279 : vector<8x1xi1> to vector<8x1xi1>
    %281 = vector.broadcast %280 : vector<8x1xi1> to vector<8x32xi1>
    %282 = arith.select %281, %276, %254 : vector<8x32xi1>, vector<8x32xf32>
    %c7_i32_93 = arith.constant 7 : i32
    %283 = arith.index_cast %c7_i32_93 : i32 to index
    %c0_94 = arith.constant 0 : index
    %c0_95 = arith.constant 0 : index
    %284 = vector.load %arg9[%283, %c0_94, %c0_95] : memref<8x8x128xf32, #tpu.memory_space<vmem>>, vector<1x8x128xf32>
    %285 = vector.shape_cast %284 : vector<1x8x128xf32> to vector<8x128xf32>
    %286 = arith.truncf %276 : vector<8x32xf32> to vector<8x32xbf16>
    %cst_96 = arith.constant dense<0.000000e+00> : vector<8x128xf32>
    %287 = tpu.matmul %286, %1, %cst_96 {dimension_numbers = #tpu.dot_dimension_numbers<[1], [0], [0], [1], [0, 0, 1, 1], [], []>} : vector<8x32xbf16>, vector<32x128xbf16>, vector<8x128xf32> -> vector<8x128xf32>
    %288 = arith.addf %285, %287 : vector<8x128xf32>
    %289 = vector.extract_strided_slice %288 {offsets = [0, 0], sizes = [8, 96], strides = [1, 1]} : vector<8x128xf32> to vector<8x96xf32>
    %290 = arith.negf %289 : vector<8x96xf32>
    %291 = math.exp %290 : vector<8x96xf32>
    %cst_97 = arith.constant 1.000000e+00 : f32
    %292 = vector.broadcast %cst_97 : f32 to vector<8x96xf32>
    %293 = arith.addf %292, %291 : vector<8x96xf32>
    %294 = arith.divf %292, %293 : vector<8x96xf32>
    %295 = vector.extract_strided_slice %294 {offsets = [0, 0], sizes = [8, 32], strides = [1, 1]} : vector<8x96xf32> to vector<8x32xf32>
    %296 = vector.extract_strided_slice %294 {offsets = [0, 32], sizes = [8, 32], strides = [1, 1]} : vector<8x96xf32> to vector<8x32xf32>
    %297 = vector.extract_strided_slice %294 {offsets = [0, 64], sizes = [8, 32], strides = [1, 1]} : vector<8x96xf32> to vector<8x32xf32>
    %298 = vector.extract_strided_slice %288 {offsets = [0, 96], sizes = [8, 32], strides = [1, 1]} : vector<8x128xf32> to vector<8x32xf32>
    %299 = math.tanh %298 : vector<8x32xf32>
    %300 = arith.mulf %295, %274 : vector<8x32xf32>
    %301 = arith.mulf %296, %299 : vector<8x32xf32>
    %302 = arith.addf %300, %301 : vector<8x32xf32>
    %303 = math.tanh %302 : vector<8x32xf32>
    %304 = arith.mulf %297, %303 : vector<8x32xf32>
    %c1_i32_98 = arith.constant 1 : i32
    %305 = arith.addi %c7_i32_93, %c1_i32_98 : i32
    %306 = vector.broadcast %305 : i32 to vector<8x1xi32>
    %307 = arith.cmpi eq, %3, %306 : vector<8x1xi32>
    %308 = vector.shape_cast %307 : vector<8x1xi1> to vector<8x1xi1>
    %309 = vector.broadcast %308 : vector<8x1xi1> to vector<8x32xi1>
    %310 = arith.select %309, %304, %282 : vector<8x32xi1>, vector<8x32xf32>
    %c8_i32_99 = arith.constant 8 : i32
    %cst_100 = arith.constant dense<0.000000e+00> : vector<1x8xf32>
    %311 = tpu.matmul %4, %310, %cst_100 {dimension_numbers = #tpu.dot_dimension_numbers<[1], [1], [0], [0], [0, 0, 1, 0], [], []>} : vector<1x32xf32>, vector<8x32xf32>, vector<1x8xf32> -> vector<1x8xf32>
    %312 = vector.broadcast %5 : vector<1x1xf32> to vector<1x8xf32>
    %313 = arith.addf %311, %312 : vector<1x8xf32>
    %314 = arith.negf %313 : vector<1x8xf32>
    %315 = math.exp %314 : vector<1x8xf32>
    %cst_101 = arith.constant 1.000000e+00 : f32
    %316 = vector.broadcast %cst_101 : f32 to vector<1x8xf32>
    %317 = arith.addf %316, %315 : vector<1x8xf32>
    %318 = arith.divf %316, %317 : vector<1x8xf32>
    %c0_102 = arith.constant 0 : index
    %c0_103 = arith.constant 0 : index
    %319 = vector.load %arg8[%c0_102, %c0_103] : memref<1x8xf32, #tpu.memory_space<vmem>>, vector<1x8xf32>
    tpu.vector_store %arg8[%c0_102, %c0_103], %318 {strides = array<i32>} : memref<1x8xf32, #tpu.memory_space<vmem>>, vector<1x8xf32>,
    return
  }
  func.func @transform_0(%arg0: i32) -> (i32, i32, i32) {
    %c0_i32 = arith.constant 0 : i32
    %c0_i32_0 = arith.constant 0 : i32
    %c0_i32_1 = arith.constant 0 : i32
    return %c0_i32, %arg0, %c0_i32_0 : i32, i32, i32
  }
  func.func @transform_1(%arg0: i32) -> (i32, i32) {
    %c0_i32 = arith.constant 0 : i32
    %c0_i32_0 = arith.constant 0 : i32
    return %arg0, %c0_i32 : i32, i32
  }
  func.func @transform_2(%arg0: i32) -> (i32, i32) {
    %c0_i32 = arith.constant 0 : i32
    %c0_i32_0 = arith.constant 0 : i32
    %c0_i32_1 = arith.constant 0 : i32
    return %c0_i32, %c0_i32_0 : i32, i32
  }
  func.func @transform_3(%arg0: i32) -> (i32, i32) {
    %c0_i32 = arith.constant 0 : i32
    %c0_i32_0 = arith.constant 0 : i32
    %c0_i32_1 = arith.constant 0 : i32
    return %c0_i32, %c0_i32_0 : i32, i32
  }
  func.func @transform_4(%arg0: i32) -> (i32, i32) {
    %c0_i32 = arith.constant 0 : i32
    %c0_i32_0 = arith.constant 0 : i32
    %c0_i32_1 = arith.constant 0 : i32
    return %c0_i32, %c0_i32_0 : i32, i32
  }
  func.func @transform_5(%arg0: i32) -> (i32, i32) {
    %c0_i32 = arith.constant 0 : i32
    %c0_i32_0 = arith.constant 0 : i32
    %c0_i32_1 = arith.constant 0 : i32
    return %c0_i32, %c0_i32_0 : i32, i32
  }
  func.func @transform_6(%arg0: i32) -> (i32, i32) {
    %c0_i32 = arith.constant 0 : i32
    %c0_i32_0 = arith.constant 0 : i32
    %c0_i32_1 = arith.constant 0 : i32
    return %c0_i32, %c0_i32_0 : i32, i32
  }
  func.func @transform_7(%arg0: i32) -> (i32, i32) {
    %c0_i32 = arith.constant 0 : i32
    %c0_i32_0 = arith.constant 0 : i32
    return %arg0, %c0_i32 : i32, i32
  }
}

</mosaic_0001>

<bundles_post_ra>
// kernel: tpu_custom_call.1
= control target key start
LH: loop header
LB: loop body
LE: loop exit
PB: predicated region body
PF: predicated region fallthrough
CT: control target
= control target key end

     0   :  { %s1848_s0 = inlined_call_operand.hbm [shape: bf16[8,8,16], index: 0, kind: input, shape index: {}]   ;;  %s1849_s1 = inlined_call_operand.vmem [shape: s32[8,1], index: 1, kind: input, shape index: {}]   ;;  %s1850_s2 = inlined_call_operand.hbm [shape: bf16[16,128], index: 2, kind: input, shape index: {}]   ;;  %s1851_s3 = inlined_call_operand.vmem [shape: bf16[32,128], index: 3, kind: input, shape index: {}]   ;;  %s1852_s4 = inlined_call_operand.vmem [shape: f32[1,128], index: 4, kind: input, shape index: {}]   ;;  %s1853_s5 = inlined_call_operand.vmem [shape: f32[1,32], index: 5, kind: input, shape index: {}]   ;;  %s1854_s6 = inlined_call_operand.<no memory space> [shape: f32[1,1], index: 6, kind: input, shape index: {}]   ;;  %s1855_s7 = inlined_call_operand.hbm [shape: f32[1,8], index: 7, kind: output, shape index: {}]  }
   0x1   :  { %v12_v0 = vstv %s1854_s6 }
   0x2   :  { %13 = vst [vmem:[#allocation3] sm:$0x1] %v12_v0 }
   0x3   :  { %14 = vsyncpa [#allocation5], 0 }
   0x4   :  { %15 = vsyncpa [#allocation8], 0 }
   0x5   :  { %16 = vsyncpa [#allocation6], 0  ;;  %s1552_s26 = smov [#allocation4]  }
   0x6   :  { %s22_s27 = sshll.u32 %s1552_s26, 4  ;;  %s23_s27 = int_to_ptr.vmem [resolvable:$true] %s22_s27 }
   0x7   :  { %s1494_s28 = scalar_lea.vmem %s23_s27, 512  ;;  %p1499_p1 = scmp.lt.s32.totalorder %s23_s27, %s23_s27 }
   0x8   :  { %p1495_p0 = scmp.ne.s32.totalorder %s23_s27, %s1494_s28  ;;  %p1500_p2 = scmp.lt.s32.totalorder %s1494_s28, %s1494_s28 }
   0xa   :  { %p1501_p3 = por %p1500_p2, %p1499_p1 }
   0xc   :  { %p1502_p4 = pnand %p1501_p3, %p1495_p0 }
   0xe   :  { %1505 = shalt.err (!%p1502_p4)
}
   0xf   :  { %s1553_s29 = smov 64   ;;  %s1554_s30 = smov 4  }
  0x10   :  { %28 = dma.hbm_to_vmem [thread:$0]  %s1848_s0, 512, %s23_s27, [#allocation5], %s1553_s29, %s1553_s29, %s1554_s30  }
  0x11   :  { %s1555_s9 = smov [#allocation7]  }
  0x12   :  { %s36_s10 = sshll.u32 %s1555_s9, 4  ;;  %s37_s10 = int_to_ptr.vmem [resolvable:$true] %s36_s10 }
  0x13   :  { %s1514_s11 = scalar_lea.vmem %s37_s10, 128  ;;  %p1519_p6 = scmp.lt.s32.totalorder %s37_s10, %s37_s10 }
  0x14   :  { %p1515_p5 = scmp.ne.s32.totalorder %s37_s10, %s1514_s11  ;;  %p1520_p7 = scmp.lt.s32.totalorder %s1514_s11, %s1514_s11 }
  0x16   :  { %p1521_p8 = por %p1520_p7, %p1519_p6 }
  0x18   :  { %p1522_p9 = pnand %p1521_p8, %p1515_p5 }
  0x1a   :  { %1525 = shalt.err (!%p1522_p9)
}
  0x1b   :  { %42 = dma.hbm_to_vmem [thread:$0]  %s1850_s2, 128, %s37_s10, [#allocation8], %s1553_s29, %s1553_s29, %s1554_s30  }
  0x1c   :  { %1546 = dma.done.wait [#allocation5], 512  }
  0x1d   :  { %1547 = vsyncadd [#allocation5], 4294966784 }
  0x1e   :  { %1548 = dma.done.wait [#allocation8], 128  }
  0x1f   :  { %1549 = vsyncadd [#allocation8], 4294967168  ;;  %v1556_v1 = vmov 0.0   ;;  %vm1557_vm0 = vmmov 0   ;;  %v1558_v2 = vmov 0   ;;  %v1622_v3 = vld [vmem:[#allocation7] sm:$0xff]  }
  0x20   :  { %1287 = vmatprep.subr.bf16.mxu0 %v1556_v1  ;;  %1289 = vmatprep.mubr.msk.bf16.mxu0 %vm1557_vm0, %v1556_v1  ;;  %vm81_vm1 = vcmask 130048   ;;  %v68_v4 = vld [vmem:[#allocation4] sm:$0xf]  ;;  %v174_v5 = vld [vmem:[#allocation4 + $0x8] sm:$0xf]  ;;  %vm468_vm2 = vcmask 261120  }
  0x21   :  { %1293 = vmatprep.subr.bf16.mxu1 %v1556_v1  ;;  %1295 = vmatprep.mubr.msk.bf16.mxu1 %vm1557_vm0, %v1556_v1  ;;  %v268_v6 = vld [vmem:[#allocation4 + $0x10] sm:$0xf]  ;;  %v362_v7 = vld [vmem:[#allocation4 + $0x18] sm:$0xf]  ;;  %v1646_v8 = vld [vmem:[%s1851_s3 + $0x8] sm:$0xff]   ;;  %s1560_s20 = smov [#allocation9]  }
  0x22   :  { %1413 = vset.pattern.permute.xlu0 %v1558_v2  ;;  %1414 = vset.pattern.permute.xlu1 %v1558_v2  ;;  %v1653_v9 = vld [vmem:[%s1851_s3] sm:$0xff]   ;;  %v221_v44 = vld [vmem:[#allocation4 + $0xc] sm:$0xf]  ;;  %v315_v46 = vld [vmem:[#allocation4 + $0x14] sm:$0xf]  ;;  %s1205_s21 = sshll.u32 %s1560_s20, 4  ;;  %s1206_s21 = int_to_ptr.vmem [resolvable:$true] %s1205_s21 }
  0x23   :  { %1288 = vmatpush3.bf16.msra.mxu0 %v1622_v3  ;;  %1294 = vmatpush3.bf16.msra.mxu1 %v1622_v3  ;;  %v1676_v24 = vld [vmem:[%s1852_s4] ss:$0 sm:$0xff]  ;;  %s1559_s4 = smov 96   ;;  %v127_v43 = vld [vmem:[#allocation4 + $0x4] sm:$0xf]  ;;  %s1530_s22 = scalar_lea.vmem %s1206_s21, 32 }
  0x24   :  { %1299 = vmatprep.subr.bf16.mxu0 %v1556_v1  ;;  %1305 = vmatprep.subr.bf16.mxu1 %v1556_v1  ;;  %v409_v47 = vld [vmem:[#allocation4 + $0x1c] sm:$0xf]  ;;  %p1531_p11 = scmp.lt.s32.totalorder %s1206_s21, %s1206_s21 }
  0x26   :  { %1290 = vmatmul.mubr.msk.bf16.vlgmr.msra.gmra.mxu0 %vm81_vm1, %v68_v4  ;;  %1296 = vmatmul.mubr.msk.bf16.vlgmr.msra.gmra.mxu1 %vm81_vm1, %v127_v43 }
  0x27   :  { %1300 = vmatpush3.bf16.msra.mxu0 %v1622_v3  ;;  %1301 = vmatprep.mubr.msk.bf16.mxu0 %vm1557_vm0, %v1556_v1 }
  0x28   :  { %1311 = vmatprep.subr.bf16.mxu0 %v1556_v1  ;;  %1306 = vmatpush3.bf16.msra.mxu1 %v1622_v3 }
  0x29   :  { %1307 = vmatprep.mubr.msk.bf16.mxu1 %vm1557_vm0, %v1556_v1  ;;  %1317 = vmatprep.subr.bf16.mxu1 %v1556_v1 }
  0x2e   :  { %1302 = vmatmul.mubr.msk.bf16.vlgmr.msra.gmra.mxu0 %vm81_vm1, %v174_v5  ;;  %1308 = vmatmul.mubr.msk.bf16.vlgmr.msra.gmra.mxu1 %vm81_vm1, %v221_v44 }
  0x2f   :  { %1312 = vmatpush3.bf16.msra.mxu0 %v1622_v3  ;;  %1313 = vmatprep.mubr.msk.bf16.mxu0 %vm1557_vm0, %v1556_v1 }
  0x30   :  { %1323 = vmatprep.subr.bf16.mxu0 %v1556_v1  ;;  %1318 = vmatpush3.bf16.msra.mxu1 %v1622_v3 }
  0x31   :  { %1319 = vmatprep.mubr.msk.bf16.mxu1 %vm1557_vm0, %v1556_v1  ;;  %1329 = vmatprep.subr.bf16.mxu1 %v1556_v1 }
  0x36   :  { %1314 = vmatmul.mubr.msk.bf16.vlgmr.msra.gmra.mxu0 %vm81_vm1, %v268_v6  ;;  %1320 = vmatmul.mubr.msk.bf16.vlgmr.msra.gmra.mxu1 %vm81_vm1, %v315_v46 }
  0x37   :  { %1324 = vmatpush3.bf16.msra.mxu0 %v1622_v3  ;;  %1325 = vmatprep.mubr.msk.bf16.mxu0 %vm1557_vm0, %v1556_v1 }
  0x38   :  { %1335 = vmatprep.subr.bf16.mxu0 %v1556_v1  ;;  %1330 = vmatpush3.bf16.msra.mxu1 %v1622_v3 }
  0x39   :  { %1331 = vmatprep.mubr.msk.bf16.mxu1 %vm1557_vm0, %v1556_v1  ;;  %1343 = vmatprep.subr.bf16.mxu1 %v1556_v1 }
  0x3e   :  { %1326 = vmatmul.mubr.msk.bf16.vlgmr.msra.gmra.mxu0 %vm81_vm1, %v362_v7  ;;  %1332 = vmatmul.mubr.msk.bf16.vlgmr.msra.gmra.mxu1 %vm81_vm1, %v409_v47 }
  0x3f   :  { %1336 = vmatpush3.bf16.msra.mxu0 %v1646_v8  ;;  %1339 = vmatprep.mubr.msk.bf16.mxu0 %vm1557_vm0, %v1556_v1 }
  0x40   :  { %1337 = vmatprep.subr.bf16.mxu0 %v1556_v1  ;;  %1344 = vmatpush3.bf16.msra.mxu1 %v1646_v8 }
  0x41   :  { %1347 = vmatprep.mubr.msk.bf16.mxu1 %vm1557_vm0, %v1556_v1  ;;  %1345 = vmatprep.subr.bf16.mxu1 %v1556_v1 }
  0x43   :  { %1338 = vmatpush3.bf16.msra.mxu0 %v1653_v9 }
  0x44   :  { %1351 = vmatprep.subr.bf16.mxu0 %v1556_v1  ;;  %1346 = vmatpush3.bf16.msra.mxu1 %v1653_v9 }
  0x45   :  { %1359 = vmatprep.subr.bf16.mxu1 %v1556_v1 }
  0x46   :  { %1340 = vmatmul.mubr.bf16.vlgmr.msra.gmra.mxu0 %v1558_v2 }
  0x47   :  { %1352 = vmatpush3.bf16.msra.mxu0 %v1646_v8  ;;  %1355 = vmatprep.mubr.msk.bf16.mxu0 %vm1557_vm0, %v1556_v1 }
  0x48   :  { %1353 = vmatprep.subr.bf16.mxu0 %v1556_v1 }
  0x4b   :  { %1354 = vmatpush3.bf16.msra.mxu0 %v1653_v9 }
  0x4c   :  { %1367 = vmatprep.subr.bf16.mxu0 %v1556_v1 }
  0xe6   :  { %v119_v10 = vpop.f32.mrf.mxu0  ;;  %v165_v51 = vpop.f32.mrf.mxu1 }
  0xe7   :  { %v120_v27 = vadd.f32 %v1676_v24, %v119_v10  ;;  %v166_v6 = vadd.f32 %v1676_v24, %v165_v51 }
  0xe8   :  { %v1291_v11 = vpop.f32.mrf.mxu0  ;;  %v1297_v52 = vpop.f32.mrf.mxu1 }
  0xea   :  { %v122_v12 = vpop.f32.mrf.mxu0  ;;  %v168_v53 = vpop.f32.mrf.mxu1 }
  0xec   :  { %v1292_v13 = vpop.f32.mrf.mxu0  ;;  %v1298_v54 = vpop.f32.mrf.mxu1 }
  0xee   :  { %v1667_v14 = vpop.f32.mrf.mxu0  ;;  %v1712_v55 = vpop.f32.mrf.mxu1 }
  0xef   :  { %v260_v54 = vadd.f32 %v1676_v24, %v1712_v55 }
  0xf0   :  { %v1303_v15 = vpop.f32.mrf.mxu0  ;;  %v1309_v56 = vpop.f32.mrf.mxu1 }
  0xf2   :  { %v215_v16 = vpop.f32.mrf.mxu0  ;;  %v262_v57 = vpop.f32.mrf.mxu1 }
  0xf4   :  { %v1304_v17 = vpop.f32.mrf.mxu0  ;;  %v1310_v58 = vpop.f32.mrf.mxu1 }
  0xf6   :  { %v1669_v18 = vpop.f32.mrf.mxu0  ;;  %v1714_v59 = vpop.f32.mrf.mxu1 }
  0xf8   :  { %v1315_v19 = vpop.f32.mrf.mxu0  ;;  %v1321_v60 = vpop.f32.mrf.mxu1 }
  0xfa   :  { %v309_v20 = vpop.f32.mrf.mxu0  ;;  %v356_v61 = vpop.f32.mrf.mxu1 }
  0xfc   :  { %v1316_v21 = vpop.f32.mrf.mxu0  ;;  %v1322_v62 = vpop.f32.mrf.mxu1 }
  0xfe   :  { %v1671_v22 = vpop.f32.mrf.mxu0  ;;  %v1716_v63 = vpop.f32.mrf.mxu1 }
 0x100   :  { %v1327_v23 = vpop.f32.mrf.mxu0  ;;  %v1333_v0 = vpop.f32.mrf.mxu1 }
 0x102   :  { %v403_v25 = vpop.f32.mrf.mxu0  ;;  %v450_v3 = vpop.f32.mrf.mxu1 }
 0x104   :  { %v1328_v26 = vpop.f32.mrf.mxu0  ;;  %v1334_v4 = vpop.f32.mrf.mxu1 }
 0x106   :  { %v506_v28 = vpop.f32.mrf.mxu0 }
 0x107   :  { %v512_v29 = vadd.f32 %v506_v28, %v120_v27 }
 0x108   :  { %v1341_v30 = vpop.f32.mrf.mxu0 }
 0x109   :  { %1418 = vtanh.f32 %v512_v29  ;;  %v1227_v34 = vmul.f32 -1.442695, %v512_v29 }
 0x10a   :  { %v509_v31 = vpop.f32.mrf.mxu0 }
 0x10b   :  { %1420 = vpow2.f32 %v1227_v34 }
 0x10c   :  { %v1342_v32 = vpop.f32.mrf.mxu0 }
 0x116   :  { %v1419_v33 = vpop.eup %1418 }
 0x117   :  { %522 = vrot.lane.b32.xlu0 %v1419_v33, %s1553_s29  ;;  %v213_v33 = vadd.f32 %v1676_v24, %v1667_v14 }
 0x118   :  { %v1421_v35 = vpop.eup %1420 }
 0x119   :  { %v516_v36 = vadd.f32 1.0, %v1421_v35 }
 0x11b   :  { %1422 = vrcp.f32 %v516_v36 }
 0x128   :  { %v1423_v37 = vpop.eup %1422 }
 0x129   :  { %v520_v40 = vmul.f32 0.0, %v1423_v37 }
 0x189   :  { %v523_v38 = vpop.permute.xlu0 %522 }
 0x18a   :  { %v525_v39 = vmul.f32 %v1423_v37, %v523_v38 }
 0x18c   :  { %527 = vrot.lane.b32.xlu0 %v525_v39, %s1559_s4 }
 0x1fe   :  { %v528_v41 = vpop.permute.xlu0 %527 }
 0x1ff   :  { %v1681_v42 = vadd.f32 %v528_v41, %v520_v40 }
 0x201   :  { %1424 = vtanh.f32 %v1681_v42 }
 0x20e   :  { %v1425_v45 = vpop.eup %1424 }
 0x20f   :  { %533 = vrot.lane.b32.xlu1 %v1425_v45, %s1553_s29 }
 0x281   :  { %v534_v48 = vpop.permute.xlu1 %533 }
 0x282   :  { %v1707_v49 = vmul.f32 %v1423_v37, %v534_v48 }
 0x284   :  { %v545_v50 = vpack.c.bf16 %v1707_v49, %v1707_v49 }
 0x286   :  { %547 = vrot.lane.b32.xlu1 %v545_v50, %s1553_s29 }
 0x2f8   :  { %v548_v5 = vpop.permute.xlu1 %547 }
 0x2f9   :  { %1348 = vmatmul.mubr.msk.bf16.vlgmr.msra.gmra.mxu1 %vm468_vm2, %v548_v5 }
 0x2fa   :  { %1360 = vmatpush3.bf16.msra.mxu1 %v1646_v8  ;;  %1363 = vmatprep.mubr.msk.bf16.mxu1 %vm1557_vm0, %v1556_v1 }
 0x2fb   :  { %1361 = vmatprep.subr.bf16.mxu1 %v1556_v1 }
 0x2fe   :  { %1362 = vmatpush3.bf16.msra.mxu1 %v1653_v9 }
 0x2ff   :  { %1375 = vmatprep.subr.bf16.mxu1 %v1556_v1 }
 0x3b9   :  { %v586_v7 = vpop.f32.mrf.mxu1 }
 0x3ba   :  { %v592_v10 = vadd.f32 %v586_v7, %v166_v6 }
 0x3bb   :  { %v1349_v11 = vpop.f32.mrf.mxu1 }
 0x3bc   :  { %1426 = vtanh.f32 %v592_v10  ;;  %v1229_v16 = vmul.f32 -1.442695, %v592_v10 }
 0x3bd   :  { %v589_v12 = vpop.f32.mrf.mxu1 }
 0x3be   :  { %1428 = vpow2.f32 %v1229_v16 }
 0x3bf   :  { %v1350_v13 = vpop.f32.mrf.mxu1 }
 0x3c9   :  { %v1427_v15 = vpop.eup %1426 }
 0x3ca   :  { %602 = vrot.lane.b32.xlu0 %v1427_v15, %s1553_s29 }
 0x3cb   :  { %v1429_v17 = vpop.eup %1428 }
 0x3cc   :  { %v596_v19 = vadd.f32 1.0, %v1429_v17 }
 0x3ce   :  { %1430 = vrcp.f32 %v596_v19  ;;  %v307_v19 = vadd.f32 %v1676_v24, %v1669_v18 }
 0x3db   :  { %v1431_v20 = vpop.eup %1430 }
 0x3dc   :  { %v600_v25 = vmul.f32 %v1431_v20, %v1681_v42 }
 0x43c   :  { %v603_v21 = vpop.permute.xlu0 %602 }
 0x43d   :  { %v605_v23 = vmul.f32 %v1431_v20, %v603_v21 }
 0x43f   :  { %607 = vrot.lane.b32.xlu1 %v605_v23, %s1559_s4 }
 0x4b1   :  { %v608_v26 = vpop.permute.xlu1 %607 }
 0x4b2   :  { %v610_v27 = vadd.f32 %v608_v26, %v600_v25 }
 0x4b4   :  { %1432 = vtanh.f32 %v610_v27 }
 0x4c1   :  { %v1433_v28 = vpop.eup %1432 }
 0x4c2   :  { %613 = vrot.lane.b32.xlu0 %v1433_v28, %s1553_s29 }
 0x534   :  { %v614_v29 = vpop.permute.xlu0 %613 }
 0x535   :  { %v1730_v30 = vmul.f32 %v1431_v20, %v614_v29 }
 0x537   :  { %v625_v31 = vpack.c.bf16 %v1730_v30, %v1730_v30 }
 0x539   :  { %627 = vrot.lane.b32.xlu1 %v625_v31, %s1553_s29 }
 0x5ab   :  { %v628_v32 = vpop.permute.xlu1 %627 }
 0x5ac   :  { %1356 = vmatmul.mubr.msk.bf16.vlgmr.msra.gmra.mxu0 %vm468_vm2, %v628_v32 }
 0x5ad   :  { %1368 = vmatpush3.bf16.msra.mxu0 %v1646_v8  ;;  %1371 = vmatprep.mubr.msk.bf16.mxu0 %vm1557_vm0, %v1556_v1 }
 0x5ae   :  { %1369 = vmatprep.subr.bf16.mxu0 %v1556_v1 }
 0x5b1   :  { %1370 = vmatpush3.bf16.msra.mxu0 %v1653_v9 }
 0x5b2   :  { %1383 = vmatprep.subr.bf16.mxu0 %v1556_v1 }
 0x66c   :  { %v666_v34 = vpop.f32.mrf.mxu0 }
 0x66d   :  { %v672_v35 = vadd.f32 %v666_v34, %v213_v33 }
 0x66e   :  { %v1357_v36 = vpop.f32.mrf.mxu0 }
 0x66f   :  { %1434 = vtanh.f32 %v672_v35  ;;  %v1231_v40 = vmul.f32 -1.442695, %v672_v35 }
 0x670   :  { %v669_v37 = vpop.f32.mrf.mxu0 }
 0x671   :  { %1436 = vpow2.f32 %v1231_v40 }
 0x672   :  { %v1358_v38 = vpop.f32.mrf.mxu0 }
 0x67c   :  { %v1435_v39 = vpop.eup %1434 }
 0x67d   :  { %682 = vrot.lane.b32.xlu0 %v1435_v39, %s1553_s29 }
 0x67e   :  { %v1437_v41 = vpop.eup %1436 }
 0x67f   :  { %v676_v42 = vadd.f32 1.0, %v1437_v41 }
 0x681   :  { %1438 = vrcp.f32 %v676_v42  ;;  %v354_v42 = vadd.f32 %v1676_v24, %v1714_v59 }
 0x68e   :  { %v1439_v43 = vpop.eup %1438 }
 0x68f   :  { %v680_v14 = vmul.f32 %v1439_v43, %v610_v27 }
 0x6ef   :  { %v683_v44 = vpop.permute.xlu0 %682 }
 0x6f0   :  { %v685_v45 = vmul.f32 %v1439_v43, %v683_v44 }
 0x6f2   :  { %687 = vrot.lane.b32.xlu1 %v685_v45, %s1559_s4 }
 0x764   :  { %v688_v46 = vpop.permute.xlu1 %687 }
 0x765   :  { %v690_v47 = vadd.f32 %v688_v46, %v680_v14 }
 0x767   :  { %1440 = vtanh.f32 %v690_v47 }
 0x774   :  { %v1441_v48 = vpop.eup %1440 }
 0x775   :  { %693 = vrot.lane.b32.xlu0 %v1441_v48, %s1553_s29 }
 0x7e7   :  { %v694_v50 = vpop.permute.xlu0 %693 }
 0x7e8   :  { %v1747_v51 = vmul.f32 %v1439_v43, %v694_v50 }
 0x7ea   :  { %v705_v52 = vpack.c.bf16 %v1747_v51, %v1747_v51 }
 0x7ec   :  { %707 = vrot.lane.b32.xlu1 %v705_v52, %s1553_s29 }
 0x85e   :  { %v708_v53 = vpop.permute.xlu1 %707 }
 0x85f   :  { %1364 = vmatmul.mubr.msk.bf16.vlgmr.msra.gmra.mxu1 %vm468_vm2, %v708_v53 }
 0x860   :  { %1376 = vmatpush3.bf16.msra.mxu1 %v1646_v8  ;;  %1379 = vmatprep.mubr.msk.bf16.mxu1 %vm1557_vm0, %v1556_v1 }
 0x861   :  { %1377 = vmatprep.subr.bf16.mxu1 %v1556_v1 }
 0x864   :  { %1378 = vmatpush3.bf16.msra.mxu1 %v1653_v9 }
 0x865   :  { %1391 = vmatprep.subr.bf16.mxu1 %v1556_v1 }
 0x91f   :  { %v746_v56 = vpop.f32.mrf.mxu1 }
 0x920   :  { %v752_v57 = vadd.f32 %v746_v56, %v260_v54 }
 0x921   :  { %v1365_v58 = vpop.f32.mrf.mxu1 }
 0x922   :  { %1442 = vtanh.f32 %v752_v57  ;;  %v1233_v0 = vmul.f32 -1.442695, %v752_v57 }
 0x923   :  { %v749_v60 = vpop.f32.mrf.mxu1 }
 0x924   :  { %1444 = vpow2.f32 %v1233_v0  ;;  %v401_v0 = vadd.f32 %v1676_v24, %v1671_v22 }
 0x925   :  { %v1366_v61 = vpop.f32.mrf.mxu1 }
 0x92f   :  { %v1443_v62 = vpop.eup %1442 }
 0x930   :  { %762 = vrot.lane.b32.xlu0 %v1443_v62, %s1553_s29 }
 0x931   :  { %v1445_v3 = vpop.eup %1444 }
 0x932   :  { %v756_v4 = vadd.f32 1.0, %v1445_v3 }
 0x934   :  { %1446 = vrcp.f32 %v756_v4 }
 0x941   :  { %v1447_v5 = vpop.eup %1446 }
 0x942   :  { %v760_v55 = vmul.f32 %v1447_v5, %v690_v47 }
 0x9a2   :  { %v763_v6 = vpop.permute.xlu0 %762 }
 0x9a3   :  { %v765_v7 = vmul.f32 %v1447_v5, %v763_v6 }
 0x9a5   :  { %767 = vrot.lane.b32.xlu1 %v765_v7, %s1559_s4 }
 0xa17   :  { %v768_v10 = vpop.permute.xlu1 %767 }
 0xa18   :  { %v770_v11 = vadd.f32 %v768_v10, %v760_v55 }
 0xa1a   :  { %1448 = vtanh.f32 %v770_v11 }
 0xa27   :  { %v1449_v12 = vpop.eup %1448 }
 0xa28   :  { %773 = vrot.lane.b32.xlu0 %v1449_v12, %s1553_s29 }
 0xa9a   :  { %v774_v13 = vpop.permute.xlu0 %773 }
 0xa9b   :  { %v1764_v15 = vmul.f32 %v1447_v5, %v774_v13 }
 0xa9d   :  { %v785_v16 = vpack.c.bf16 %v1764_v15, %v1764_v15 }
 0xa9f   :  { %787 = vrot.lane.b32.xlu1 %v785_v16, %s1553_s29 }
 0xb11   :  { %v788_v17 = vpop.permute.xlu1 %787 }
 0xb12   :  { %1372 = vmatmul.mubr.msk.bf16.vlgmr.msra.gmra.mxu0 %vm468_vm2, %v788_v17 }
 0xb13   :  { %1384 = vmatpush3.bf16.msra.mxu0 %v1646_v8  ;;  %1387 = vmatprep.mubr.msk.bf16.mxu0 %vm1557_vm0, %v1556_v1 }
 0xb14   :  { %1385 = vmatprep.subr.bf16.mxu0 %v1556_v1 }
 0xb17   :  { %1386 = vmatpush3.bf16.msra.mxu0 %v1653_v9 }
 0xb18   :  { %1399 = vmatprep.subr.mxu0 %v1556_v1 }
 0xbd2   :  { %v826_v20 = vpop.f32.mrf.mxu0 }
 0xbd3   :  { %v832_v21 = vadd.f32 %v826_v20, %v307_v19 }
 0xbd4   :  { %v1373_v23 = vpop.f32.mrf.mxu0 }
 0xbd5   :  { %1450 = vtanh.f32 %v832_v21  ;;  %v1235_v28 = vmul.f32 -1.442695, %v832_v21 }
 0xbd6   :  { %v829_v25 = vpop.f32.mrf.mxu0 }
 0xbd7   :  { %1452 = vpow2.f32 %v1235_v28 }
 0xbd8   :  { %v1374_v26 = vpop.f32.mrf.mxu0 }
 0xbe2   :  { %v1451_v27 = vpop.eup %1450 }
 0xbe3   :  { %842 = vrot.lane.b32.xlu0 %v1451_v27, %s1553_s29  ;;  %v448_v27 = vadd.f32 %v1676_v24, %v1716_v63 }
 0xbe4   :  { %v1453_v29 = vpop.eup %1452 }
 0xbe5   :  { %v836_v31 = vadd.f32 1.0, %v1453_v29 }
 0xbe7   :  { %1454 = vrcp.f32 %v836_v31 }
 0xbf4   :  { %v1455_v32 = vpop.eup %1454 }
 0xbf5   :  { %v840_v18 = vmul.f32 %v1455_v32, %v770_v11 }
 0xc55   :  { %v843_v33 = vpop.permute.xlu0 %842 }
 0xc56   :  { %v845_v34 = vmul.f32 %v1455_v32, %v843_v33 }
 0xc58   :  { %847 = vrot.lane.b32.xlu1 %v845_v34, %s1559_s4  ;;  %v65_v34 = vld [vmem:[%s1849_s1] sm:$0xff] }
 0xc59   :  { %vm537_vm3 = vcmp.eq.s32.totalorder %v65_v34, 1  ;;  %vm777_vm4 = vcmp.eq.s32.totalorder %v65_v34, 4  ;;  %vm937_vm5 = vcmp.eq.s32.totalorder %v65_v34, 6  ;;  %vm1097_vm6 = vcmp.eq.s32.totalorder %v65_v34, 8 }
 0xc5a   :  { %v778_v24 = vsel %vm777_vm4, 1, %v1558_v2  ;;  %v938_v63 = vsel %vm937_vm5, 1, %v1558_v2  ;;  %vm617_vm7 = vcmp.eq.s32.totalorder %v65_v34, 2  ;;  %vm697_vm8 = vcmp.eq.s32.totalorder %v65_v34, 3 }
 0xc5b   :  { %vm857_vm9 = vcmp.eq.s32.totalorder %v65_v34, 5  ;;  %vm1017_vm10 = vcmp.eq.s32.totalorder %v65_v34, 7  ;;  %vm1197_vm4 = vcmask 57344  }
 0xcca   :  { %v848_v35 = vpop.permute.xlu1 %847 }
 0xccb   :  { %v850_v36 = vadd.f32 %v848_v35, %v840_v18  ;;  %v538_v35 = vsel %vm537_vm3, 1, %v1558_v2 }
 0xccd   :  { %1456 = vtanh.f32 %v850_v36 }
 0xcda   :  { %v1457_v37 = vpop.eup %1456 }
 0xcdb   :  { %853 = vrot.lane.b32.xlu0 %v1457_v37, %s1553_s29 }
 0xd4d   :  { %v854_v38 = vpop.permute.xlu0 %853 }
 0xd4e   :  { %v1781_v39 = vmul.f32 %v1455_v32, %v854_v38 }
 0xd50   :  { %v865_v40 = vpack.c.bf16 %v1781_v39, %v1781_v39 }
 0xd52   :  { %867 = vrot.lane.b32.xlu1 %v865_v40, %s1553_s29 }
 0xdc4   :  { %v868_v41 = vpop.permute.xlu1 %867 }
 0xdc5   :  { %1380 = vmatmul.mubr.msk.bf16.vlgmr.msra.gmra.mxu1 %vm468_vm2, %v868_v41 }
 0xdc6   :  { %1392 = vmatpush3.bf16.msra.mxu1 %v1646_v8  ;;  %1395 = vmatprep.mubr.msk.bf16.mxu1 %vm1557_vm0, %v1556_v1 }
 0xdc7   :  { %1393 = vmatprep.subr.bf16.mxu1 %v1556_v1 }
 0xdca   :  { %1394 = vmatpush3.bf16.msra.mxu1 %v1653_v9 }
 0xe85   :  { %v906_v43 = vpop.f32.mrf.mxu1 }
 0xe86   :  { %v912_v44 = vadd.f32 %v906_v43, %v354_v42 }
 0xe87   :  { %v1381_v45 = vpop.f32.mrf.mxu1 }
 0xe88   :  { %1458 = vtanh.f32 %v912_v44  ;;  %v1237_v8 = vmul.f32 -1.442695, %v912_v44  ;;  %v618_v44 = vsel %vm617_vm7, 1, %v1558_v2  ;;  %v698_v45 = vsel %vm697_vm8, 1, %v1558_v2 }
 0xe89   :  { %v909_v14 = vpop.f32.mrf.mxu1 }
 0xe8a   :  { %1460 = vpow2.f32 %v1237_v8  ;;  %v858_v14 = vsel %vm857_vm9, 1, %v1558_v2 }
 0xe8b   :  { %v1382_v46 = vpop.f32.mrf.mxu1 }
 0xe8c   :  { %v1018_v46 = vsel %vm1017_vm10, 1, %v1558_v2 }
 0xe95   :  { %v1459_v47 = vpop.eup %1458 }
 0xe96   :  { %922 = vrot.lane.b32.xlu0 %v1459_v47, %s1553_s29 }
 0xe97   :  { %v1461_v48 = vpop.eup %1460 }
 0xe98   :  { %v916_v50 = vadd.f32 1.0, %v1461_v48 }
 0xe9a   :  { %1462 = vrcp.f32 %v916_v50 }
 0xea7   :  { %v1463_v52 = vpop.eup %1462 }
 0xea8   :  { %v920_v59 = vmul.f32 %v1463_v52, %v850_v36  ;;  %v1098_v36 = vsel %vm1097_vm6, 1, %v1558_v2 }
 0xf08   :  { %v923_v53 = vpop.permute.xlu0 %922 }
 0xf09   :  { %v925_v9 = vmul.f32 %v1463_v52, %v923_v53 }
 0xf0b   :  { %927 = vrot.lane.b32.xlu1 %v925_v9, %s1559_s4 }
 0xf7d   :  { %v928_v54 = vpop.permute.xlu1 %927 }
 0xf7e   :  { %v930_v56 = vadd.f32 %v928_v54, %v920_v59 }
 0xf80   :  { %1464 = vtanh.f32 %v930_v56 }
 0xf8d   :  { %v1465_v57 = vpop.eup %1464 }
 0xf8e   :  { %933 = vrot.lane.b32.xlu0 %v1465_v57, %s1553_s29 }
0x1000   :  { %v934_v58 = vpop.permute.xlu0 %933 }
0x1001   :  { %v1797_v60 = vmul.f32 %v1463_v52, %v934_v58  ;;  %v67_v52 = vld [vmem:[#allocation3] sm:$0x1] }
0x1003   :  { %v945_v61 = vpack.c.bf16 %v1797_v60, %v1797_v60 }
0x1005   :  { %947 = vrot.lane.b32.xlu1 %v945_v61, %s1553_s29 }
0x1077   :  { %v948_v62 = vpop.permute.xlu1 %947 }
0x1078   :  { %1388 = vmatmul.mubr.msk.bf16.vlgmr.msra.gmra.mxu0 %vm468_vm2, %v948_v62 }
0x1079   :  { %1401 = vmatprep.mubr.msk.f32.mxu0 %vm1557_vm0, %v1556_v1 }
0x1138   :  { %v986_v3 = vpop.f32.mrf.mxu0 }
0x1139   :  { %v992_v4 = vadd.f32 %v986_v3, %v401_v0 }
0x113a   :  { %v1389_v5 = vpop.f32.mrf.mxu0 }
0x113b   :  { %1466 = vtanh.f32 %v992_v4  ;;  %v1239_v10 = vmul.f32 -1.442695, %v992_v4 }
0x113c   :  { %v989_v6 = vpop.f32.mrf.mxu0 }
0x113d   :  { %1468 = vpow2.f32 %v1239_v10 }
0x113e   :  { %v1390_v7 = vpop.f32.mrf.mxu0 }
0x1148   :  { %v1467_v55 = vpop.eup %1466 }
0x1149   :  { %1002 = vrot.lane.b32.xlu0 %v1467_v55, %s1553_s29 }
0x114a   :  { %v1469_v11 = vpop.eup %1468 }
0x114b   :  { %v996_v12 = vadd.f32 1.0, %v1469_v11 }
0x114d   :  { %1470 = vrcp.f32 %v996_v12 }
0x115a   :  { %v1471_v13 = vpop.eup %1470 }
0x115b   :  { %v1000_v22 = vmul.f32 %v1471_v13, %v930_v56 }
0x11bb   :  { %v1003_v16 = vpop.permute.xlu0 %1002 }
0x11bc   :  { %v1005_v1 = vmul.f32 %v1471_v13, %v1003_v16 }
0x11be   :  { %1007 = vrot.lane.b32.xlu1 %v1005_v1, %s1559_s4 }
0x1230   :  { %v1008_v17 = vpop.permute.xlu1 %1007 }
0x1231   :  { %v1010_v19 = vadd.f32 %v1008_v17, %v1000_v22 }
0x1233   :  { %1472 = vtanh.f32 %v1010_v19 }
0x1240   :  { %v1473_v20 = vpop.eup %1472 }
0x1241   :  { %1013 = vrot.lane.b32.xlu0 %v1473_v20, %s1553_s29 }
0x12b3   :  { %v1014_v21 = vpop.permute.xlu0 %1013 }
0x12b4   :  { %v1810_v23 = vmul.f32 %v1471_v13, %v1014_v21 }
0x12b6   :  { %v1025_v25 = vpack.c.bf16 %v1810_v23, %v1810_v23 }
0x12b8   :  { %1027 = vrot.lane.b32.xlu1 %v1025_v25, %s1553_s29 }
0x132a   :  { %v1028_v26 = vpop.permute.xlu1 %1027 }
0x132b   :  { %1396 = vmatmul.mubr.msk.bf16.vlgmr.msra.gmra.mxu1 %vm468_vm2, %v1028_v26 }
0x13eb   :  { %v1066_v28 = vpop.f32.mrf.mxu1 }
0x13ec   :  { %v1072_v29 = vadd.f32 %v1066_v28, %v448_v27 }
0x13ed   :  { %v1397_v31 = vpop.f32.mrf.mxu1 }
0x13ee   :  { %1474 = vtanh.f32 %v1072_v29  ;;  %v1241_v37 = vmul.f32 -1.442695, %v1072_v29 }
0x13ef   :  { %v1069_v32 = vpop.f32.mrf.mxu1 }
0x13f0   :  { %1476 = vpow2.f32 %v1241_v37 }
0x13f1   :  { %v1398_v33 = vpop.f32.mrf.mxu1 }
0x13fb   :  { %v1475_v18 = vpop.eup %1474 }
0x13fc   :  { %1082 = vrot.lane.b32.xlu0 %v1475_v18, %s1553_s29 }
0x13fd   :  { %v1477_v38 = vpop.eup %1476 }
0x13fe   :  { %v1076_v40 = vadd.f32 1.0, %v1477_v38 }
0x1400   :  { %540 = vperm.xlu0 %1413, %v538_v35   ;;  %1478 = vrcp.f32 %v1076_v40 }
0x1404   :  { %780 = vperm.xlu0 %1413, %v778_v24  }
0x1408   :  { %940 = vperm.xlu0 %1413, %v938_v63  }
0x140c   :  { %1100 = vperm.xlu0 %1413, %v1098_v36  }
0x140d   :  { %v1479_v41 = vpop.eup %1478 }
0x140e   :  { %v1080_v47 = vmul.f32 %v1479_v41, %v1010_v19 }
0x146e   :  { %v1083_v42 = vpop.permute.xlu0 %1082 }
0x146f   :  { %v1085_v43 = vmul.f32 %v1479_v41, %v1083_v42 }
0x1471   :  { %1087 = vrot.lane.b32.xlu1 %v1085_v43, %s1559_s4 }
0x1475   :  { %620 = vperm.xlu1 %1414, %v618_v44  }
0x1479   :  { %700 = vperm.xlu1 %1414, %v698_v45  }
0x147b   :  { %v541_v59 = vpop.permute.xlu0 %540 }
0x147c   :  { %vm542_vm11 = vcmp.eq.s32.totalorder %v541_v59, 1 }
0x147d   :  { %860 = vperm.xlu1 %1414, %v858_v14   ;;  %v543_v2 = vsel %vm542_vm11, %v1707_v49, 0.0 }
0x147f   :  { %v781_v54 = vpop.permute.xlu0 %780 }
0x1480   :  { %vm782_vm14 = vcmp.eq.s32.totalorder %v781_v54, 1 }
0x1481   :  { %1020 = vperm.xlu1 %1414, %v1018_v46  }
0x1483   :  { %v941_v61 = vpop.permute.xlu0 %940 }
0x1484   :  { %vm942_vm0 = vcmp.eq.s32.totalorder %v941_v61, 1 }
0x1487   :  { %v1101_v4 = vpop.permute.xlu0 %1100 }
0x1488   :  { %vm1102_vm3 = vcmp.eq.s32.totalorder %v1101_v4, 1 }
0x14e3   :  { %v1088_v8 = vpop.permute.xlu1 %1087 }
0x14e4   :  { %v1090_v48 = vadd.f32 %v1088_v8, %v1080_v47 }
0x14e6   :  { %1480 = vtanh.f32 %v1090_v48 }
0x14f0   :  { %v621_v53 = vpop.permute.xlu1 %620 }
0x14f1   :  { %vm622_vm12 = vcmp.eq.s32.totalorder %v621_v53, 1 }
0x14f2   :  { %v623_v57 = vsel %vm622_vm12, %v1730_v30, %v543_v2 }
0x14f3   :  { %v1481_v50 = vpop.eup %1480 }
0x14f4   :  { %1093 = vrot.lane.b32.xlu1 %v1481_v50, %s1553_s29  ;;  %v701_v9 = vpop.permute.xlu1 %700 }
0x14f5   :  { %vm702_vm13 = vcmp.eq.s32.totalorder %v701_v9, 1 }
0x14f6   :  { %v703_v58 = vsel %vm702_vm13, %v1747_v51, %v623_v57 }
0x14f7   :  { %v783_v0 = vsel %vm782_vm14, %v1764_v15, %v703_v58  ;;  %v66_v15 = vld [vmem:[%s1853_s5] sm:$0x1]  ;;  %s1526_s5 = scalar_lea.vmem %s1206_s21, 16 }
0x14f8   :  { %1106 = vperm.xlu1 %1414, %v67_v52   ;;  %v861_v56 = vpop.permute.xlu1 %860  ;;  %p1527_p10 = scmp.ne.s32.totalorder %s1206_s21, %s1526_s5  ;;  %p1532_p12 = scmp.lt.s32.totalorder %s1530_s22, %s1526_s5 }
0x14f9   :  { %vm862_vm15 = vcmp.eq.s32.totalorder %v861_v56, 1 }
0x14fa   :  { %v863_v3 = vsel %vm862_vm15, %v1781_v39, %v783_v0  ;;  %v1109_v39 = vlaneseq  ;;  %p1533_p13 = por %p1532_p12, %p1531_p11 }
0x14fb   :  { %v943_v6 = vsel %vm942_vm0, %v1797_v60, %v863_v3 }
0x14fc   :  { %v1021_v62 = vpop.permute.xlu1 %1020  ;;  %v1110_v55 = vshrl.u32 %v1109_v39, 7  ;;  %p1534_p0 = pnand %p1533_p13, %p1527_p10 }
0x14fd   :  { %vm1022_vm1 = vcmp.eq.s32.totalorder %v1021_v62, 1 }
0x14fe   :  { %v1023_v49 = vsel %vm1022_vm1, %v1810_v23, %v943_v6  ;;  %v1111_v10 = vsub.s32 0, %v1110_v55 }
0x1566   :  { %v1094_v5 = vpop.permute.xlu1 %1093 }
0x1567   :  { %v1096_v7 = vmul.f32 %v1479_v41, %v1094_v5 }
0x1569   :  { %v1103_v30 = vsel %vm1102_vm3, %v1096_v7, %v1023_v49 }
0x156a   :  { %1114 = vrot.lane.b32.xlu0 %v1103_v30, %s1553_s29 }
0x1573   :  { %v1107_v60 = vpop.permute.xlu1 %1106 }
0x1574   :  { %v1112_v11 = vrot.slane %v1107_v60, %v1111_v10 }
0x15dc   :  { %v1115_v51 = vpop.permute.xlu0 %1114 }
0x15dd   :  { %1400 = vmatpush3.xpose.msk.msra.mxu0 %vm468_vm2, %v1115_v51 }
0x15e0   :  { %1402 = vmatmul.mubr.msk.f32.vlgmr.msra.gmra.mxu0 %vm468_vm2, %v66_v15 }
0x16a0   :  { %v1187_v12 = vpop.f32.mrf.mxu0 }
0x16a1   :  { %v1188_v13 = vadd.f32 %v1187_v12, %v1112_v11 }
0x16a2   :  { %v1403_v16 = vpop.f32.mrf.mxu0 }
0x16a3   :  { %v1244_v1 = vmul.f32 -1.442695, %v1188_v13 }
0x16a5   :  { %1482 = vpow2.f32 %v1244_v1 }
0x16b2   :  { %v1483_v22 = vpop.eup %1482 }
0x16b3   :  { %v1194_v17 = vadd.f32 1.0, %v1483_v22 }
0x16b5   :  { %1484 = vrcp.f32 %v1194_v17 }
0x16c2   :  { %v1485_v19 = vpop.eup %1484 }
0x16c3   :  { %1198 = vst.msk [vmem:[#allocation9] sm:$0x1] %vm1197_vm4, %v1485_v19 }
0x16c4   :  { %1537 = shalt.err (!%p1534_p0)
}
0x16c5   :  { %1208 = dma.vmem_to_hbm [thread:$0]  %s1206_s21, 16, %s1855_s7, [#allocation6]  }
0x16c6   :  { %1550 = dma.done.wait [#allocation6], 16  }
0x16c7   :  { %1551 = vsyncadd [#allocation6], 4294967280 }
0x16c8   :  { %1212 = vsyncpa [#allocation5], 1 }
0x16c9   :  { %1213 = vsyncpa [#allocation8], 1 }
0x16ca   :  { %1214 = vsyncpa [#allocation6], 1 }

</bundles_post_ra>
